<compile_context>
chip_gen: v6e
topology: v6e:2x2x1
jax: 0.10.0
libtpu: 0.0.40
codegen_flags: <defaults>
</compile_context>

<pallas_src>
from functools import partial

import jax
import jax.numpy as jnp
from jax.experimental import pallas as pl
from jax.experimental.pallas import tpu as pltpu


def encoder_layer_kernel(x_ref, bias_ref,
                         wqkv_ref, bqkv_ref, wo_ref, bo_ref,
                         g1_ref, be1_ref,
                         w1_ref, bf1_ref, w2_ref, bf2_ref,
                         g2_ref, be2_ref,
                         out_ref, *, num_heads, batch, seq):
    x = x_ref[...]                               # (N, D) f32, N = batch * seq (rows folded)
    bias = bias_ref[...]                         # (batch, 1, seq) additive key-padding mask, f32
    _, d_model = x.shape
    dh = d_model // num_heads

    # --- fused Q/K/V projection: one (N, D) x (D, 3D) MXU matmul (bf16 in, f32 accum) ---
    xb = x.astype(jnp.bfloat16)
    qkv = jnp.dot(xb, wqkv_ref[...], preferred_element_type=jnp.float32) + bqkv_ref[...]
    # 1/sqrt(dh) is already folded into Wq / bq in the wrapper.

    # --- multi-head self-attention, batched over the batch dim via dot_general ---
    # TODO(synk): heads stay a static loop; fully batching heads in-kernel needs a
    # (B,S,H,dh)->(B,H,S,dh) transpose that Mosaic does not lower — at production sizes
    # pre-split heads in the wrapper (XLA) and feed (B*H, S, dh) tiles instead.
    head_outs = []
    for h in range(num_heads):
        qh = qkv[:, h * dh:(h + 1) * dh].reshape(batch, seq, dh).astype(jnp.bfloat16)
        kh = qkv[:, d_model + h * dh:d_model + (h + 1) * dh].reshape(batch, seq, dh).astype(jnp.bfloat16)
        vh = qkv[:, 2 * d_model + h * dh:2 * d_model + (h + 1) * dh].reshape(batch, seq, dh).astype(jnp.bfloat16)

        s = jnp.einsum("bqd,bkd->bqk", qh, kh,
                       preferred_element_type=jnp.float32) + bias           # (batch, S, S) f32
        m = jnp.max(s, axis=-1, keepdims=True)
        p = jnp.exp(s - m)                                                   # unnormalized probs (f32)
        l = jnp.sum(p, axis=-1, keepdims=True)
        o = jnp.einsum("bqk,bkd->bqd", p.astype(jnp.bfloat16), vh,
                       preferred_element_type=jnp.float32)
        o = o * pl.reciprocal(l, approx=True)                                # deferred softmax norm (EUP)
        head_outs.append(o.reshape(batch * seq, dh))
    attn = jnp.concatenate(head_outs, axis=-1)                               # (N, D) f32

    attn = jnp.dot(attn.astype(jnp.bfloat16), wo_ref[...],
                   preferred_element_type=jnp.float32) + bo_ref[...]

    # TODO(synk): dropout is identity (eval mode); no RNG applied.
    # --- residual + LayerNorm 1 (f32) ---
    h1 = x + attn
    mu1 = jnp.mean(h1, axis=-1, keepdims=True)
    c1 = h1 - mu1
    var1 = jnp.mean(c1 * c1, axis=-1, keepdims=True)
    h1n = c1 * jax.lax.rsqrt(var1 + 1e-5) * g1_ref[...] + be1_ref[...]

    # --- feed-forward: Linear -> ReLU -> Linear (bf16 MXU inputs, f32 accumulation) ---
    f = jnp.dot(h1n.astype(jnp.bfloat16), w1_ref[...],
                preferred_element_type=jnp.float32) + bf1_ref[...]
    f = jnp.maximum(f, 0.0)
    f = jnp.dot(f.astype(jnp.bfloat16), w2_ref[...],
                preferred_element_type=jnp.float32) + bf2_ref[...]

    # --- residual + LayerNorm 2 (f32) ---
    h2 = h1n + f
    mu2 = jnp.mean(h2, axis=-1, keepdims=True)
    c2 = h2 - mu2
    var2 = jnp.mean(c2 * c2, axis=-1, keepdims=True)
    out = c2 * jax.lax.rsqrt(var2 + 1e-5) * g2_ref[...] + be2_ref[...]

    # NOTE: at realistic model widths (D a multiple of 128) this store is lane-dense for free;
    # only the toy D=32 demo pays masked partial stores here.
    out_ref[...] = out


def transformer_encoder_layer(src, mask, params, num_heads, batch_block=None):
    """src: (B, S, D) f32; mask: (B, S) key-padding mask (1.0 = attend, 0.0 = masked)."""
    B, S, D = src.shape
    F = params["w1"].shape[1]
    dh = D // num_heads
    if batch_block is None:
        # Whole batch in one grid step: folds B*S rows into the projection / FFN matmuls and
        # amortizes the ~0.35us per-grid-step overhead.  On v7x (2 TensorCores) with large B,
        # pass batch_block = B // 2 (or smaller) so the "parallel" axis populates both cores.
        batch_block = B
    assert B % batch_block == 0, "batch_block must divide B"
    n_tiles = B // batch_block
    rows = batch_block * S

    f32, bf16 = jnp.float32, jnp.bfloat16
    # Fold the 1/sqrt(dh) attention scale into Wq / bq (constant parameter transform),
    # then fuse Q/K/V weights into a single (D, 3D) matmul operand (bf16 halves weight DMA).
    scale = 1.0 / float(dh) ** 0.5
    wqkv = jnp.concatenate([params["wq"] * scale, params["wk"], params["wv"]], axis=1).astype(bf16)
    bqkv = jnp.concatenate([params["bq"] * scale, params["bk"], params["bv"]], axis=1).astype(f32)
    wo = params["wo"].astype(bf16)
    w1 = params["w1"].astype(bf16)
    w2 = params["w2"].astype(bf16)

    x2d = src.reshape(B * S, D).astype(f32)
    # Additive key-padding bias kept in f32 (do NOT cast the -1e9 mask to bf16).
    bias = jnp.where(mask.astype(bool), 0.0, -1e9).astype(f32).reshape(B, 1, S)

    def full(shape):
        return pl.BlockSpec(shape, lambda i, _s=shape: (0,) * len(_s))

    in_specs = [
        pl.BlockSpec((rows, D), lambda i: (i, 0)),              # folded (batch_block*S, D) activations
        pl.BlockSpec((batch_block, 1, S), lambda i: (i, 0, 0)), # per-batch additive key mask
        full((D, 3 * D)), full((1, 3 * D)),                     # fused Wqkv, bqkv
        full((D, D)), full((1, D)),                             # Wo, bo
        full((1, D)), full((1, D)),                             # ln1 gamma, beta
        full((D, F)), full((1, F)),                             # W1, b1
        full((F, D)), full((1, D)),                             # W2, b2
        full((1, D)), full((1, D)),                             # ln2 gamma, beta
    ]
    # TODO(synk): for production sizes on v7x (64 MiB VMEM) re-tile this monolithic body:
    # flash-style key-block attention, K-loop accumulator over F for the FFN, single-buffered
    # weight blocks, and an explicit vmem_limit_bytes.

    out = pl.pallas_call(
        partial(encoder_layer_kernel, num_heads=num_heads, batch=batch_block, seq=S),
        out_shape=jax.ShapeDtypeStruct((B * S, D), f32),
        grid=(n_tiles,),
        in_specs=in_specs,
        out_specs=pl.BlockSpec((rows, D), lambda i: (i, 0)),
        compiler_params=pltpu.CompilerParams(dimension_semantics=("parallel",)),
    )(x2d, bias, wqkv, bqkv, wo, params["bo"],
      params["g1"], params["be1"],
      w1, params["bf1"], w2, params["bf2"],
      params["g2"], params["be2"])
    return out.reshape(B, S, D)


def reference(src, mask, params, num_heads):
    """Pure-JAX f32 reference for correctness checking."""
    B, S, D = src.shape
    dh = D // num_heads
    bias = jnp.where(mask.astype(bool), 0.0, -1e9)[:, None, None, :]    # (B,1,1,S)
    q = src @ params["wq"] + params["bq"]
    k = src @ params["wk"] + params["bk"]
    v = src @ params["wv"] + params["bv"]

    def split(t):
        return t.reshape(B, S, num_heads, dh).transpose(0, 2, 1, 3)

    qh, kh, vh = split(q), split(k), split(v)
    s = jnp.einsum("bhqd,bhkd->bhqk", qh, kh) / jnp.sqrt(jnp.float32(dh)) + bias
    p = jax.nn.softmax(s, axis=-1)
    o = jnp.einsum("bhqk,bhkd->bhqd", p, vh).transpose(0, 2, 1, 3).reshape(B, S, D)
    attn = o @ params["wo"] + params["bo"]

    def ln(x, g, b):
        mu = x.mean(-1, keepdims=True)
        var = ((x - mu) ** 2).mean(-1, keepdims=True)
        return (x - mu) / jnp.sqrt(var + 1e-5) * g + b

    h1n = ln(src + attn, params["g1"], params["be1"])
    f = jax.nn.relu(h1n @ params["w1"] + params["bf1"]) @ params["w2"] + params["bf2"]
    return ln(h1n + f, params["g2"], params["be2"])


if __name__ == "__main__":
    # small shapes consistent with the module: dim_model=32, heads=4, ff=64, seq=8, batch=2
    B, S, D, H, F = 2, 8, 32, 4, 64
    key = jax.random.PRNGKey(0)
    ks = jax.random.split(key, 16)

    def init(k, shape, scale=0.1):
        return (scale * jax.random.normal(k, shape)).astype(jnp.float32)

    params = dict(
        wq=init(ks[0], (D, D)), bq=init(ks[1], (1, D)),
        wk=init(ks[2], (D, D)), bk=init(ks[3], (1, D)),
        wv=init(ks[4], (D, D)), bv=init(ks[5], (1, D)),
        wo=init(ks[6], (D, D)), bo=init(ks[7], (1, D)),
        g1=jnp.ones((1, D), jnp.float32), be1=jnp.zeros((1, D), jnp.float32),
        w1=init(ks[8], (D, F)), bf1=init(ks[9], (1, F)),
        w2=init(ks[10], (F, D)), bf2=init(ks[11], (1, D)),
        g2=jnp.ones((1, D), jnp.float32), be2=jnp.zeros((1, D), jnp.float32),
    )

    src = jax.random.normal(ks[12], (B, S, D), jnp.float32)
    # key-padding mask: batch 1 has its last 2 key positions masked out
    mask = jnp.ones((B, S), jnp.float32).at[1, 6:].set(0.0)

    out = transformer_encoder_layer(src, mask, params, H)
    jax.block_until_ready(out)

    ref = reference(src, mask, params, H)
    assert out.shape == (B, S, D)
    # bf16 MXU inputs + approximate softmax reciprocal -> loosened tolerance vs f32 reference
    assert jnp.allclose(out, ref, atol=5e-2, rtol=5e-2), "mismatch vs pure-JAX reference"
    print("KERNEL_OK")
</pallas_src>

<mosaic_0001>
module attributes {stable_mosaic.version = 11 : i64} {
  func.func @encoder_layer_kernel(%arg0: i32, %arg1: memref<16x32xf32, #tpu.memory_space<vmem>>, %arg2: memref<2x1x8xf32, #tpu.memory_space<vmem>>, %arg3: memref<32x96xbf16, #tpu.memory_space<vmem>>, %arg4: memref<1x96xf32, #tpu.memory_space<vmem>>, %arg5: memref<32x32xbf16, #tpu.memory_space<vmem>>, %arg6: memref<1x32xf32, #tpu.memory_space<vmem>>, %arg7: memref<1x32xf32, #tpu.memory_space<vmem>>, %arg8: memref<1x32xf32, #tpu.memory_space<vmem>>, %arg9: memref<32x64xbf16, #tpu.memory_space<vmem>>, %arg10: memref<1x64xf32, #tpu.memory_space<vmem>>, %arg11: memref<64x32xbf16, #tpu.memory_space<vmem>>, %arg12: memref<1x32xf32, #tpu.memory_space<vmem>>, %arg13: memref<1x32xf32, #tpu.memory_space<vmem>>, %arg14: memref<1x32xf32, #tpu.memory_space<vmem>>, %arg15: memref<16x32xf32, #tpu.memory_space<vmem>>) attributes {dimension_semantics = [#tpu.dimension_semantics<parallel>], iteration_bounds = array<i64: 1>, scalar_prefetch = 0 : i64, scratch_operands = 0 : i64, tpu.core_type = #tpu.core_type<tc>, window_params = [{transform_indices = @transform_0, window_bounds = array<i64: 16, 32>}, {transform_indices = @transform_1, window_bounds = array<i64: 2, 1, 8>}, {pipeline_mode = #tpu.pipeline_mode<synchronous>, transform_indices = @transform_2, window_bounds = array<i64: 32, 96>}, {pipeline_mode = #tpu.pipeline_mode<synchronous>, transform_indices = @transform_3, window_bounds = array<i64: 1, 96>}, {pipeline_mode = #tpu.pipeline_mode<synchronous>, transform_indices = @transform_4, window_bounds = array<i64: 32, 32>}, {pipeline_mode = #tpu.pipeline_mode<synchronous>, transform_indices = @transform_5, window_bounds = array<i64: 1, 32>}, {pipeline_mode = #tpu.pipeline_mode<synchronous>, transform_indices = @transform_6, window_bounds = array<i64: 1, 32>}, {pipeline_mode = #tpu.pipeline_mode<synchronous>, transform_indices = @transform_7, window_bounds = array<i64: 1, 32>}, {pipeline_mode = #tpu.pipeline_mode<synchronous>, transform_indices = @transform_8, window_bounds = array<i64: 32, 64>}, {pipeline_mode = #tpu.pipeline_mode<synchronous>, transform_indices = @transform_9, window_bounds = array<i64: 1, 64>}, {pipeline_mode = #tpu.pipeline_mode<synchronous>, transform_indices = @transform_10, window_bounds = array<i64: 64, 32>}, {pipeline_mode = #tpu.pipeline_mode<synchronous>, transform_indices = @transform_11, window_bounds = array<i64: 1, 32>}, {pipeline_mode = #tpu.pipeline_mode<synchronous>, transform_indices = @transform_12, window_bounds = array<i64: 1, 32>}, {pipeline_mode = #tpu.pipeline_mode<synchronous>, transform_indices = @transform_13, window_bounds = array<i64: 1, 32>}, {transform_indices = @transform_14, window_bounds = array<i64: 16, 32>}]} {
    %c0 = arith.constant 0 : index
    %c0_0 = arith.constant 0 : index
    %0 = vector.load %arg1[%c0, %c0_0] : memref<16x32xf32, #tpu.memory_space<vmem>>, vector<16x32xf32>
    %c0_1 = arith.constant 0 : index
    %c0_2 = arith.constant 0 : index
    %c0_3 = arith.constant 0 : index
    %1 = vector.load %arg2[%c0_1, %c0_2, %c0_3] : memref<2x1x8xf32, #tpu.memory_space<vmem>>, vector<2x1x8xf32>
    %2 = arith.truncf %0 : vector<16x32xf32> to vector<16x32xbf16>
    %c0_4 = arith.constant 0 : index
    %c0_5 = arith.constant 0 : index
    %3 = vector.load %arg3[%c0_4, %c0_5] : memref<32x96xbf16, #tpu.memory_space<vmem>>, vector<32x96xbf16>
    %cst = arith.constant dense<0.000000e+00> : vector<16x96xf32>
    %4 = tpu.matmul %2, %3, %cst {dimension_numbers = #tpu.dot_dimension_numbers<[1], [0], [0], [1], [0, 0, 1, 1], [], []>} : vector<16x32xbf16>, vector<32x96xbf16>, vector<16x96xf32> -> vector<16x96xf32>
    %c0_6 = arith.constant 0 : index
    %c0_7 = arith.constant 0 : index
    %5 = vector.load %arg4[%c0_6, %c0_7] : memref<1x96xf32, #tpu.memory_space<vmem>>, vector<1x96xf32>
    %6 = vector.broadcast %5 : vector<1x96xf32> to vector<16x96xf32>
    %7 = arith.addf %4, %6 : vector<16x96xf32>
    %8 = vector.extract_strided_slice %7 {offsets = [0, 0], sizes = [16, 8], strides = [1, 1]} : vector<16x96xf32> to vector<16x8xf32>
    %9 = vector.shape_cast %8 : vector<16x8xf32> to vector<2x8x8xf32>
    %10 = arith.truncf %9 : vector<2x8x8xf32> to vector<2x8x8xbf16>
    %11 = vector.extract_strided_slice %7 {offsets = [0, 32], sizes = [16, 8], strides = [1, 1]} : vector<16x96xf32> to vector<16x8xf32>
    %12 = vector.shape_cast %11 : vector<16x8xf32> to vector<2x8x8xf32>
    %13 = arith.truncf %12 : vector<2x8x8xf32> to vector<2x8x8xbf16>
    %14 = vector.extract_strided_slice %7 {offsets = [0, 64], sizes = [16, 8], strides = [1, 1]} : vector<16x96xf32> to vector<16x8xf32>
    %15 = vector.shape_cast %14 : vector<16x8xf32> to vector<2x8x8xf32>
    %16 = arith.truncf %15 : vector<2x8x8xf32> to vector<2x8x8xbf16>
    "tpu.trace_start"() <{level = 10 : i32, message = "bqd,bkd->bqk"}> : () -> ()
    %cst_8 = arith.constant dense<0.000000e+00> : vector<2x8x8xf32>
    %17 = tpu.matmul %10, %13, %cst_8 {dimension_numbers = #tpu.dot_dimension_numbers<[2], [2], [1], [1], [0, 0, 0, 1, 1, 1], [0], [0]>} : vector<2x8x8xbf16>, vector<2x8x8xbf16>, vector<2x8x8xf32> -> vector<2x8x8xf32>
    "tpu.trace_stop"() : () -> ()
    %18 = vector.broadcast %1 : vector<2x1x8xf32> to vector<2x8x8xf32>
    %19 = arith.addf %17, %18 : vector<2x8x8xf32>
    %cst_9 = arith.constant dense<0xFF800000> : vector<2x8xf32>
    %20 = vector.multi_reduction <maximumf>, %19, %cst_9 [2] : vector<2x8x8xf32> to vector<2x8xf32>
    %21 = vector.shape_cast %20 : vector<2x8xf32> to vector<2x8x1xf32>
    %22 = vector.broadcast %21 : vector<2x8x1xf32> to vector<2x8x8xf32>
    %23 = arith.subf %19, %22 : vector<2x8x8xf32>
    %24 = math.exp %23 : vector<2x8x8xf32>
    %cst_10 = arith.constant dense<0.000000e+00> : vector<2x8xf32>
    %25 = vector.multi_reduction <add>, %24, %cst_10 [2] : vector<2x8x8xf32> to vector<2x8xf32>
    %26 = vector.shape_cast %25 : vector<2x8xf32> to vector<2x8x1xf32>
    %27 = arith.truncf %24 : vector<2x8x8xf32> to vector<2x8x8xbf16>
    "tpu.trace_start"() <{level = 10 : i32, message = "bqk,bkd->bqd"}> : () -> ()
    %cst_11 = arith.constant dense<0.000000e+00> : vector<2x8x8xf32>
    %28 = tpu.matmul %27, %16, %cst_11 {dimension_numbers = #tpu.dot_dimension_numbers<[2], [1], [1], [2], [0, 0, 0, 1, 1, 2], [0], [0]>} : vector<2x8x8xbf16>, vector<2x8x8xbf16>, vector<2x8x8xf32> -> vector<2x8x8xf32>
    "tpu.trace_stop"() : () -> ()
    %29 = tpu.reciprocal %26 {approx = true} : vector<2x8x1xf32> -> vector<2x8x1xf32>
    %30 = vector.broadcast %29 : vector<2x8x1xf32> to vector<2x8x8xf32>
    %31 = arith.mulf %28, %30 : vector<2x8x8xf32>
    %32 = vector.shape_cast %31 : vector<2x8x8xf32> to vector<16x8xf32>
    %33 = vector.extract_strided_slice %7 {offsets = [0, 8], sizes = [16, 8], strides = [1, 1]} : vector<16x96xf32> to vector<16x8xf32>
    %34 = vector.shape_cast %33 : vector<16x8xf32> to vector<2x8x8xf32>
    %35 = arith.truncf %34 : vector<2x8x8xf32> to vector<2x8x8xbf16>
    %36 = vector.extract_strided_slice %7 {offsets = [0, 40], sizes = [16, 8], strides = [1, 1]} : vector<16x96xf32> to vector<16x8xf32>
    %37 = vector.shape_cast %36 : vector<16x8xf32> to vector<2x8x8xf32>
    %38 = arith.truncf %37 : vector<2x8x8xf32> to vector<2x8x8xbf16>
    %39 = vector.extract_strided_slice %7 {offsets = [0, 72], sizes = [16, 8], strides = [1, 1]} : vector<16x96xf32> to vector<16x8xf32>
    %40 = vector.shape_cast %39 : vector<16x8xf32> to vector<2x8x8xf32>
    %41 = arith.truncf %40 : vector<2x8x8xf32> to vector<2x8x8xbf16>
    "tpu.trace_start"() <{level = 10 : i32, message = "bqd,bkd->bqk"}> : () -> ()
    %cst_12 = arith.constant dense<0.000000e+00> : vector<2x8x8xf32>
    %42 = tpu.matmul %35, %38, %cst_12 {dimension_numbers = #tpu.dot_dimension_numbers<[2], [2], [1], [1], [0, 0, 0, 1, 1, 1], [0], [0]>} : vector<2x8x8xbf16>, vector<2x8x8xbf16>, vector<2x8x8xf32> -> vector<2x8x8xf32>
    "tpu.trace_stop"() : () -> ()
    %43 = vector.broadcast %1 : vector<2x1x8xf32> to vector<2x8x8xf32>
    %44 = arith.addf %42, %43 : vector<2x8x8xf32>
    %cst_13 = arith.constant dense<0xFF800000> : vector<2x8xf32>
    %45 = vector.multi_reduction <maximumf>, %44, %cst_13 [2] : vector<2x8x8xf32> to vector<2x8xf32>
    %46 = vector.shape_cast %45 : vector<2x8xf32> to vector<2x8x1xf32>
    %47 = vector.broadcast %46 : vector<2x8x1xf32> to vector<2x8x8xf32>
    %48 = arith.subf %44, %47 : vector<2x8x8xf32>
    %49 = math.exp %48 : vector<2x8x8xf32>
    %cst_14 = arith.constant dense<0.000000e+00> : vector<2x8xf32>
    %50 = vector.multi_reduction <add>, %49, %cst_14 [2] : vector<2x8x8xf32> to vector<2x8xf32>
    %51 = vector.shape_cast %50 : vector<2x8xf32> to vector<2x8x1xf32>
    %52 = arith.truncf %49 : vector<2x8x8xf32> to vector<2x8x8xbf16>
    "tpu.trace_start"() <{level = 10 : i32, message = "bqk,bkd->bqd"}> : () -> ()
    %cst_15 = arith.constant dense<0.000000e+00> : vector<2x8x8xf32>
    %53 = tpu.matmul %52, %41, %cst_15 {dimension_numbers = #tpu.dot_dimension_numbers<[2], [1], [1], [2], [0, 0, 0, 1, 1, 2], [0], [0]>} : vector<2x8x8xbf16>, vector<2x8x8xbf16>, vector<2x8x8xf32> -> vector<2x8x8xf32>
    "tpu.trace_stop"() : () -> ()
    %54 = tpu.reciprocal %51 {approx = true} : vector<2x8x1xf32> -> vector<2x8x1xf32>
    %55 = vector.broadcast %54 : vector<2x8x1xf32> to vector<2x8x8xf32>
    %56 = arith.mulf %53, %55 : vector<2x8x8xf32>
    %57 = vector.shape_cast %56 : vector<2x8x8xf32> to vector<16x8xf32>
    %58 = vector.extract_strided_slice %7 {offsets = [0, 16], sizes = [16, 8], strides = [1, 1]} : vector<16x96xf32> to vector<16x8xf32>
    %59 = vector.shape_cast %58 : vector<16x8xf32> to vector<2x8x8xf32>
    %60 = arith.truncf %59 : vector<2x8x8xf32> to vector<2x8x8xbf16>
    %61 = vector.extract_strided_slice %7 {offsets = [0, 48], sizes = [16, 8], strides = [1, 1]} : vector<16x96xf32> to vector<16x8xf32>
    %62 = vector.shape_cast %61 : vector<16x8xf32> to vector<2x8x8xf32>
    %63 = arith.truncf %62 : vector<2x8x8xf32> to vector<2x8x8xbf16>
    %64 = vector.extract_strided_slice %7 {offsets = [0, 80], sizes = [16, 8], strides = [1, 1]} : vector<16x96xf32> to vector<16x8xf32>
    %65 = vector.shape_cast %64 : vector<16x8xf32> to vector<2x8x8xf32>
    %66 = arith.truncf %65 : vector<2x8x8xf32> to vector<2x8x8xbf16>
    "tpu.trace_start"() <{level = 10 : i32, message = "bqd,bkd->bqk"}> : () -> ()
    %cst_16 = arith.constant dense<0.000000e+00> : vector<2x8x8xf32>
    %67 = tpu.matmul %60, %63, %cst_16 {dimension_numbers = #tpu.dot_dimension_numbers<[2], [2], [1], [1], [0, 0, 0, 1, 1, 1], [0], [0]>} : vector<2x8x8xbf16>, vector<2x8x8xbf16>, vector<2x8x8xf32> -> vector<2x8x8xf32>
    "tpu.trace_stop"() : () -> ()
    %68 = vector.broadcast %1 : vector<2x1x8xf32> to vector<2x8x8xf32>
    %69 = arith.addf %67, %68 : vector<2x8x8xf32>
    %cst_17 = arith.constant dense<0xFF800000> : vector<2x8xf32>
    %70 = vector.multi_reduction <maximumf>, %69, %cst_17 [2] : vector<2x8x8xf32> to vector<2x8xf32>
    %71 = vector.shape_cast %70 : vector<2x8xf32> to vector<2x8x1xf32>
    %72 = vector.broadcast %71 : vector<2x8x1xf32> to vector<2x8x8xf32>
    %73 = arith.subf %69, %72 : vector<2x8x8xf32>
    %74 = math.exp %73 : vector<2x8x8xf32>
    %cst_18 = arith.constant dense<0.000000e+00> : vector<2x8xf32>
    %75 = vector.multi_reduction <add>, %74, %cst_18 [2] : vector<2x8x8xf32> to vector<2x8xf32>
    %76 = vector.shape_cast %75 : vector<2x8xf32> to vector<2x8x1xf32>
    %77 = arith.truncf %74 : vector<2x8x8xf32> to vector<2x8x8xbf16>
    "tpu.trace_start"() <{level = 10 : i32, message = "bqk,bkd->bqd"}> : () -> ()
    %cst_19 = arith.constant dense<0.000000e+00> : vector<2x8x8xf32>
    %78 = tpu.matmul %77, %66, %cst_19 {dimension_numbers = #tpu.dot_dimension_numbers<[2], [1], [1], [2], [0, 0, 0, 1, 1, 2], [0], [0]>} : vector<2x8x8xbf16>, vector<2x8x8xbf16>, vector<2x8x8xf32> -> vector<2x8x8xf32>
    "tpu.trace_stop"() : () -> ()
    %79 = tpu.reciprocal %76 {approx = true} : vector<2x8x1xf32> -> vector<2x8x1xf32>
    %80 = vector.broadcast %79 : vector<2x8x1xf32> to vector<2x8x8xf32>
    %81 = arith.mulf %78, %80 : vector<2x8x8xf32>
    %82 = vector.shape_cast %81 : vector<2x8x8xf32> to vector<16x8xf32>
    %83 = vector.extract_strided_slice %7 {offsets = [0, 24], sizes = [16, 8], strides = [1, 1]} : vector<16x96xf32> to vector<16x8xf32>
    %84 = vector.shape_cast %83 : vector<16x8xf32> to vector<2x8x8xf32>
    %85 = arith.truncf %84 : vector<2x8x8xf32> to vector<2x8x8xbf16>
    %86 = vector.extract_strided_slice %7 {offsets = [0, 56], sizes = [16, 8], strides = [1, 1]} : vector<16x96xf32> to vector<16x8xf32>
    %87 = vector.shape_cast %86 : vector<16x8xf32> to vector<2x8x8xf32>
    %88 = arith.truncf %87 : vector<2x8x8xf32> to vector<2x8x8xbf16>
    %89 = vector.extract_strided_slice %7 {offsets = [0, 88], sizes = [16, 8], strides = [1, 1]} : vector<16x96xf32> to vector<16x8xf32>
    %90 = vector.shape_cast %89 : vector<16x8xf32> to vector<2x8x8xf32>
    %91 = arith.truncf %90 : vector<2x8x8xf32> to vector<2x8x8xbf16>
    "tpu.trace_start"() <{level = 10 : i32, message = "bqd,bkd->bqk"}> : () -> ()
    %cst_20 = arith.constant dense<0.000000e+00> : vector<2x8x8xf32>
    %92 = tpu.matmul %85, %88, %cst_20 {dimension_numbers = #tpu.dot_dimension_numbers<[2], [2], [1], [1], [0, 0, 0, 1, 1, 1], [0], [0]>} : vector<2x8x8xbf16>, vector<2x8x8xbf16>, vector<2x8x8xf32> -> vector<2x8x8xf32>
    "tpu.trace_stop"() : () -> ()
    %93 = vector.broadcast %1 : vector<2x1x8xf32> to vector<2x8x8xf32>
    %94 = arith.addf %92, %93 : vector<2x8x8xf32>
    %cst_21 = arith.constant dense<0xFF800000> : vector<2x8xf32>
    %95 = vector.multi_reduction <maximumf>, %94, %cst_21 [2] : vector<2x8x8xf32> to vector<2x8xf32>
    %96 = vector.shape_cast %95 : vector<2x8xf32> to vector<2x8x1xf32>
    %97 = vector.broadcast %96 : vector<2x8x1xf32> to vector<2x8x8xf32>
    %98 = arith.subf %94, %97 : vector<2x8x8xf32>
    %99 = math.exp %98 : vector<2x8x8xf32>
    %cst_22 = arith.constant dense<0.000000e+00> : vector<2x8xf32>
    %100 = vector.multi_reduction <add>, %99, %cst_22 [2] : vector<2x8x8xf32> to vector<2x8xf32>
    %101 = vector.shape_cast %100 : vector<2x8xf32> to vector<2x8x1xf32>
    %102 = arith.truncf %99 : vector<2x8x8xf32> to vector<2x8x8xbf16>
    "tpu.trace_start"() <{level = 10 : i32, message = "bqk,bkd->bqd"}> : () -> ()
    %cst_23 = arith.constant dense<0.000000e+00> : vector<2x8x8xf32>
    %103 = tpu.matmul %102, %91, %cst_23 {dimension_numbers = #tpu.dot_dimension_numbers<[2], [1], [1], [2], [0, 0, 0, 1, 1, 2], [0], [0]>} : vector<2x8x8xbf16>, vector<2x8x8xbf16>, vector<2x8x8xf32> -> vector<2x8x8xf32>
    "tpu.trace_stop"() : () -> ()
    %104 = tpu.reciprocal %101 {approx = true} : vector<2x8x1xf32> -> vector<2x8x1xf32>
    %105 = vector.broadcast %104 : vector<2x8x1xf32> to vector<2x8x8xf32>
    %106 = arith.mulf %103, %105 : vector<2x8x8xf32>
    %107 = vector.shape_cast %106 : vector<2x8x8xf32> to vector<16x8xf32>
    %108 = tpu.concatenate %32, %57, %82, %107 in 1 : vector<16x8xf32>, vector<16x8xf32>, vector<16x8xf32>, vector<16x8xf32> -> vector<16x32xf32>
    %109 = arith.truncf %108 : vector<16x32xf32> to vector<16x32xbf16>
    %c0_24 = arith.constant 0 : index
    %c0_25 = arith.constant 0 : index
    %110 = vector.load %arg5[%c0_24, %c0_25] : memref<32x32xbf16, #tpu.memory_space<vmem>>, vector<32x32xbf16>
    %cst_26 = arith.constant dense<0.000000e+00> : vector<16x32xf32>
    %111 = tpu.matmul %109, %110, %cst_26 {dimension_numbers = #tpu.dot_dimension_numbers<[1], [0], [0], [1], [0, 0, 1, 1], [], []>} : vector<16x32xbf16>, vector<32x32xbf16>, vector<16x32xf32> -> vector<16x32xf32>
    %c0_27 = arith.constant 0 : index
    %c0_28 = arith.constant 0 : index
    %112 = vector.load %arg6[%c0_27, %c0_28] : memref<1x32xf32, #tpu.memory_space<vmem>>, vector<1x32xf32>
    %113 = vector.broadcast %112 : vector<1x32xf32> to vector<16x32xf32>
    %114 = arith.addf %111, %113 : vector<16x32xf32>
    %115 = arith.addf %0, %114 : vector<16x32xf32>
    %cst_29 = arith.constant dense<0.000000e+00> : vector<16xf32>
    %116 = vector.multi_reduction <add>, %115, %cst_29 [1] : vector<16x32xf32> to vector<16xf32>
    %117 = vector.shape_cast %116 : vector<16xf32> to vector<16x1xf32>
    %cst_30 = arith.constant 3.200000e+01 : f32
    %118 = vector.broadcast %cst_30 : f32 to vector<16x1xf32>
    %119 = arith.divf %117, %118 : vector<16x1xf32>
    %120 = vector.broadcast %119 : vector<16x1xf32> to vector<16x32xf32>
    %121 = arith.subf %115, %120 : vector<16x32xf32>
    %122 = arith.mulf %121, %121 : vector<16x32xf32>
    %cst_31 = arith.constant dense<0.000000e+00> : vector<16xf32>
    %123 = vector.multi_reduction <add>, %122, %cst_31 [1] : vector<16x32xf32> to vector<16xf32>
    %124 = vector.shape_cast %123 : vector<16xf32> to vector<16x1xf32>
    %cst_32 = arith.constant 3.200000e+01 : f32
    %125 = vector.broadcast %cst_32 : f32 to vector<16x1xf32>
    %126 = arith.divf %124, %125 : vector<16x1xf32>
    %cst_33 = arith.constant 9.99999974E-6 : f32
    %127 = vector.broadcast %cst_33 : f32 to vector<16x1xf32>
    %128 = arith.addf %126, %127 : vector<16x1xf32>
    %129 = math.rsqrt %128 : vector<16x1xf32>
    %130 = vector.broadcast %129 : vector<16x1xf32> to vector<16x32xf32>
    %131 = arith.mulf %121, %130 : vector<16x32xf32>
    %c0_34 = arith.constant 0 : index
    %c0_35 = arith.constant 0 : index
    %132 = vector.load %arg7[%c0_34, %c0_35] : memref<1x32xf32, #tpu.memory_space<vmem>>, vector<1x32xf32>
    %133 = vector.broadcast %132 : vector<1x32xf32> to vector<16x32xf32>
    %134 = arith.mulf %131, %133 : vector<16x32xf32>
    %c0_36 = arith.constant 0 : index
    %c0_37 = arith.constant 0 : index
    %135 = vector.load %arg8[%c0_36, %c0_37] : memref<1x32xf32, #tpu.memory_space<vmem>>, vector<1x32xf32>
    %136 = vector.broadcast %135 : vector<1x32xf32> to vector<16x32xf32>
    %137 = arith.addf %134, %136 : vector<16x32xf32>
    %138 = arith.truncf %137 : vector<16x32xf32> to vector<16x32xbf16>
    %c0_38 = arith.constant 0 : index
    %c0_39 = arith.constant 0 : index
    %139 = vector.load %arg9[%c0_38, %c0_39] : memref<32x64xbf16, #tpu.memory_space<vmem>>, vector<32x64xbf16>
    %cst_40 = arith.constant dense<0.000000e+00> : vector<16x64xf32>
    %140 = tpu.matmul %138, %139, %cst_40 {dimension_numbers = #tpu.dot_dimension_numbers<[1], [0], [0], [1], [0, 0, 1, 1], [], []>} : vector<16x32xbf16>, vector<32x64xbf16>, vector<16x64xf32> -> vector<16x64xf32>
    %c0_41 = arith.constant 0 : index
    %c0_42 = arith.constant 0 : index
    %141 = vector.load %arg10[%c0_41, %c0_42] : memref<1x64xf32, #tpu.memory_space<vmem>>, vector<1x64xf32>
    %142 = vector.broadcast %141 : vector<1x64xf32> to vector<16x64xf32>
    %143 = arith.addf %140, %142 : vector<16x64xf32>
    %cst_43 = arith.constant 0.000000e+00 : f32
    %144 = vector.broadcast %cst_43 : f32 to vector<16x64xf32>
    %145 = arith.maximumf %143, %144 : vector<16x64xf32>
    %146 = arith.truncf %145 : vector<16x64xf32> to vector<16x64xbf16>
    %c0_44 = arith.constant 0 : index
    %c0_45 = arith.constant 0 : index
    %147 = vector.load %arg11[%c0_44, %c0_45] : memref<64x32xbf16, #tpu.memory_space<vmem>>, vector<64x32xbf16>
    %cst_46 = arith.constant dense<0.000000e+00> : vector<16x32xf32>
    %148 = tpu.matmul %146, %147, %cst_46 {dimension_numbers = #tpu.dot_dimension_numbers<[1], [0], [0], [1], [0, 0, 1, 1], [], []>} : vector<16x64xbf16>, vector<64x32xbf16>, vector<16x32xf32> -> vector<16x32xf32>
    %c0_47 = arith.constant 0 : index
    %c0_48 = arith.constant 0 : index
    %149 = vector.load %arg12[%c0_47, %c0_48] : memref<1x32xf32, #tpu.memory_space<vmem>>, vector<1x32xf32>
    %150 = vector.broadcast %149 : vector<1x32xf32> to vector<16x32xf32>
    %151 = arith.addf %148, %150 : vector<16x32xf32>
    %152 = arith.addf %137, %151 : vector<16x32xf32>
    %cst_49 = arith.constant dense<0.000000e+00> : vector<16xf32>
    %153 = vector.multi_reduction <add>, %152, %cst_49 [1] : vector<16x32xf32> to vector<16xf32>
    %154 = vector.shape_cast %153 : vector<16xf32> to vector<16x1xf32>
    %cst_50 = arith.constant 3.200000e+01 : f32
    %155 = vector.broadcast %cst_50 : f32 to vector<16x1xf32>
    %156 = arith.divf %154, %155 : vector<16x1xf32>
    %157 = vector.broadcast %156 : vector<16x1xf32> to vector<16x32xf32>
    %158 = arith.subf %152, %157 : vector<16x32xf32>
    %159 = arith.mulf %158, %158 : vector<16x32xf32>
    %cst_51 = arith.constant dense<0.000000e+00> : vector<16xf32>
    %160 = vector.multi_reduction <add>, %159, %cst_51 [1] : vector<16x32xf32> to vector<16xf32>
    %161 = vector.shape_cast %160 : vector<16xf32> to vector<16x1xf32>
    %cst_52 = arith.constant 3.200000e+01 : f32
    %162 = vector.broadcast %cst_52 : f32 to vector<16x1xf32>
    %163 = arith.divf %161, %162 : vector<16x1xf32>
    %cst_53 = arith.constant 9.99999974E-6 : f32
    %164 = vector.broadcast %cst_53 : f32 to vector<16x1xf32>
    %165 = arith.addf %163, %164 : vector<16x1xf32>
    %166 = math.rsqrt %165 : vector<16x1xf32>
    %167 = vector.broadcast %166 : vector<16x1xf32> to vector<16x32xf32>
    %168 = arith.mulf %158, %167 : vector<16x32xf32>
    %c0_54 = arith.constant 0 : index
    %c0_55 = arith.constant 0 : index
    %169 = vector.load %arg13[%c0_54, %c0_55] : memref<1x32xf32, #tpu.memory_space<vmem>>, vector<1x32xf32>
    %170 = vector.broadcast %169 : vector<1x32xf32> to vector<16x32xf32>
    %171 = arith.mulf %168, %170 : vector<16x32xf32>
    %c0_56 = arith.constant 0 : index
    %c0_57 = arith.constant 0 : index
    %172 = vector.load %arg14[%c0_56, %c0_57] : memref<1x32xf32, #tpu.memory_space<vmem>>, vector<1x32xf32>
    %173 = vector.broadcast %172 : vector<1x32xf32> to vector<16x32xf32>
    %174 = arith.addf %171, %173 : vector<16x32xf32>
    %c0_58 = arith.constant 0 : index
    %c0_59 = arith.constant 0 : index
    %175 = vector.load %arg15[%c0_58, %c0_59] : memref<16x32xf32, #tpu.memory_space<vmem>>, vector<16x32xf32>
    tpu.vector_store %arg15[%c0_58, %c0_59], %174 {strides = array<i32>} : memref<16x32xf32, #tpu.memory_space<vmem>>, vector<16x32xf32>,
    return
  }
  func.func @transform_0(%arg0: i32) -> (i32, i32) {
    %c0_i32 = arith.constant 0 : i32
    %c0_i32_0 = arith.constant 0 : i32
    return %arg0, %c0_i32 : i32, i32
  }
  func.func @transform_1(%arg0: i32) -> (i32, i32, i32) {
    %c0_i32 = arith.constant 0 : i32
    %c0_i32_0 = arith.constant 0 : i32
    %c0_i32_1 = arith.constant 0 : i32
    return %arg0, %c0_i32, %c0_i32_0 : i32, i32, i32
  }
  func.func @transform_2(%arg0: i32) -> (i32, i32) {
    %c0_i32 = arith.constant 0 : i32
    %c0_i32_0 = arith.constant 0 : i32
    %c0_i32_1 = arith.constant 0 : i32
    return %c0_i32, %c0_i32_0 : i32, i32
  }
  func.func @transform_3(%arg0: i32) -> (i32, i32) {
    %c0_i32 = arith.constant 0 : i32
    %c0_i32_0 = arith.constant 0 : i32
    %c0_i32_1 = arith.constant 0 : i32
    return %c0_i32, %c0_i32_0 : i32, i32
  }
  func.func @transform_4(%arg0: i32) -> (i32, i32) {
    %c0_i32 = arith.constant 0 : i32
    %c0_i32_0 = arith.constant 0 : i32
    %c0_i32_1 = arith.constant 0 : i32
    return %c0_i32, %c0_i32_0 : i32, i32
  }
  func.func @transform_5(%arg0: i32) -> (i32, i32) {
    %c0_i32 = arith.constant 0 : i32
    %c0_i32_0 = arith.constant 0 : i32
    %c0_i32_1 = arith.constant 0 : i32
    return %c0_i32, %c0_i32_0 : i32, i32
  }
  func.func @transform_6(%arg0: i32) -> (i32, i32) {
    %c0_i32 = arith.constant 0 : i32
    %c0_i32_0 = arith.constant 0 : i32
    %c0_i32_1 = arith.constant 0 : i32
    return %c0_i32, %c0_i32_0 : i32, i32
  }
  func.func @transform_7(%arg0: i32) -> (i32, i32) {
    %c0_i32 = arith.constant 0 : i32
    %c0_i32_0 = arith.constant 0 : i32
    %c0_i32_1 = arith.constant 0 : i32
    return %c0_i32, %c0_i32_0 : i32, i32
  }
  func.func @transform_8(%arg0: i32) -> (i32, i32) {
    %c0_i32 = arith.constant 0 : i32
    %c0_i32_0 = arith.constant 0 : i32
    %c0_i32_1 = arith.constant 0 : i32
    return %c0_i32, %c0_i32_0 : i32, i32
  }
  func.func @transform_9(%arg0: i32) -> (i32, i32) {
    %c0_i32 = arith.constant 0 : i32
    %c0_i32_0 = arith.constant 0 : i32
    %c0_i32_1 = arith.constant 0 : i32
    return %c0_i32, %c0_i32_0 : i32, i32
  }
  func.func @transform_10(%arg0: i32) -> (i32, i32) {
    %c0_i32 = arith.constant 0 : i32
    %c0_i32_0 = arith.constant 0 : i32
    %c0_i32_1 = arith.constant 0 : i32
    return %c0_i32, %c0_i32_0 : i32, i32
  }
  func.func @transform_11(%arg0: i32) -> (i32, i32) {
    %c0_i32 = arith.constant 0 : i32
    %c0_i32_0 = arith.constant 0 : i32
    %c0_i32_1 = arith.constant 0 : i32
    return %c0_i32, %c0_i32_0 : i32, i32
  }
  func.func @transform_12(%arg0: i32) -> (i32, i32) {
    %c0_i32 = arith.constant 0 : i32
    %c0_i32_0 = arith.constant 0 : i32
    %c0_i32_1 = arith.constant 0 : i32
    return %c0_i32, %c0_i32_0 : i32, i32
  }
  func.func @transform_13(%arg0: i32) -> (i32, i32) {
    %c0_i32 = arith.constant 0 : i32
    %c0_i32_0 = arith.constant 0 : i32
    %c0_i32_1 = arith.constant 0 : i32
    return %c0_i32, %c0_i32_0 : i32, i32
  }
  func.func @transform_14(%arg0: i32) -> (i32, i32) {
    %c0_i32 = arith.constant 0 : i32
    %c0_i32_0 = arith.constant 0 : i32
    return %arg0, %c0_i32 : i32, i32
  }
}

</mosaic_0001>

<bundles_post_ra>
// kernel: tpu_custom_call.1
= control target key start
LH: loop header
LB: loop body
LE: loop exit
PB: predicated region body
PF: predicated region fallthrough
CT: control target
= control target key end

     0   :  { %19 = vsyncpa [#allocation3], 0  ;;  %s2270_s0 = inlined_call_operand.vmem [shape: f32[16,32], index: 0, kind: input, shape index: {}]   ;;  %s2271_s1 = inlined_call_operand.hbm [shape: f32[2,1,8], index: 1, kind: input, shape index: {}]   ;;  %s2272_s2 = inlined_call_operand.vmem [shape: bf16[32,96], index: 2, kind: input, shape index: {}]   ;;  %s2273_s3 = inlined_call_operand.vmem [shape: f32[1,96], index: 3, kind: input, shape index: {}]   ;;  %s2274_s4 = inlined_call_operand.vmem [shape: bf16[32,32], index: 4, kind: input, shape index: {}]   ;;  %s2275_s5 = inlined_call_operand.vmem [shape: f32[1,32], index: 5, kind: input, shape index: {}]   ;;  %s2276_s6 = inlined_call_operand.hbm [shape: f32[1,32], index: 6, kind: input, shape index: {}]   ;;  %s2277_s7 = inlined_call_operand.hbm [shape: f32[1,32], index: 7, kind: input, shape index: {}]   ;;  %s2278_s8 = inlined_call_operand.hbm [shape: bf16[32,64], index: 8, kind: input, shape index: {}]   ;;  %s2279_s9 = inlined_call_operand.hbm [shape: f32[1,64], index: 9, kind: input, shape index: {}]   ;;  %s2280_s10 = inlined_call_operand.vmem [shape: bf16[64,32], index: 10, kind: input, shape index: {}]   ;;  %s2281_s11 = inlined_call_operand.vmem [shape: f32[1,32], index: 11, kind: input, shape index: {}]   ;;  %s2282_s12 = inlined_call_operand.vmem [shape: f32[1,32], index: 12, kind: input, shape index: {}]   ;;  %s2283_s13 = inlined_call_operand.vmem [shape: f32[1,32], index: 13, kind: input, shape index: {}]   ;;  %s2284_s14 = inlined_call_operand.hbm [shape: f32[16,32], index: 14, kind: output, shape index: {}]  }
   0x1   :  { %20 = vsyncpa [#allocation6], 0 }
   0x2   :  { %21 = vsyncpa [#allocation9], 0 }
   0x3   :  { %22 = vsyncpa [#allocation4], 0  ;;  %s1883_s29 = smov [#allocation5]   ;;  %s1884_s15 = smov [#allocation8]  }
   0x4   :  { %s51_s30 = sshll.u32 %s1883_s29, 4  ;;  %s70_s16 = sshll.u32 %s1884_s15, 4  ;;  %s52_s30 = int_to_ptr.vmem [resolvable:$true] %s51_s30  ;;  %s71_s16 = int_to_ptr.vmem [resolvable:$true] %s70_s16 }
   0x5   :  { %s1763_s17 = scalar_lea.vmem %s52_s30, 16  ;;  %s1767_s18 = scalar_lea.vmem %s52_s30, 32 }
   0x6   :  { %p1764_p0 = scmp.ne.s32.totalorder %s52_s30, %s1763_s17  ;;  %p1768_p1 = scmp.lt.s32.totalorder %s52_s30, %s52_s30 }
   0x7   :  { %p1769_p2 = scmp.lt.s32.totalorder %s1767_s18, %s1763_s17 }
   0x9   :  { %p1770_p3 = por %p1769_p2, %p1768_p1 }
   0xb   :  { %p1771_p4 = pnand %p1770_p3, %p1764_p0 }
   0xd   :  { %1774 = shalt.err (!%p1771_p4)
}
   0xe   :  { %54 = dma.hbm_to_vmem [thread:$0]  %s2276_s6, 16, %s52_s30, [#allocation6]  }
   0xf   :  { %s1783_s21 = scalar_lea.vmem %s71_s16, 256  ;;  %p1788_p6 = scmp.lt.s32.totalorder %s71_s16, %s71_s16 }
  0x10   :  { %p1784_p5 = scmp.ne.s32.totalorder %s71_s16, %s1783_s21  ;;  %p1789_p7 = scmp.lt.s32.totalorder %s1783_s21, %s1783_s21 }
  0x12   :  { %p1790_p8 = por %p1789_p7, %p1788_p6 }
  0x14   :  { %p1791_p9 = pnand %p1790_p8, %p1784_p5 }
  0x16   :  { %1794 = shalt.err (!%p1791_p9)
}
  0x17   :  { %s1885_s22 = smov 64   ;;  %s1886_s23 = smov 4  }
  0x18   :  { %76 = dma.hbm_to_vmem [thread:$0]  %s2278_s8, 256, %s71_s16, [#allocation9], %s1885_s22, %s1885_s22, %s1886_s23  }
  0x19   :  { %s1887_s26 = smov [#allocation2]  }
  0x1a   :  { %s30_s27 = sshll.u32 %s1887_s26, 4  ;;  %s31_s27 = int_to_ptr.vmem [resolvable:$true] %s30_s27 }
  0x1b   :  { %s1803_s28 = scalar_lea.vmem %s31_s27, 32  ;;  %p1808_p11 = scmp.lt.s32.totalorder %s31_s27, %s31_s27 }
  0x1c   :  { %p1804_p10 = scmp.ne.s32.totalorder %s31_s27, %s1803_s28  ;;  %p1809_p12 = scmp.lt.s32.totalorder %s1803_s28, %s1803_s28 }
  0x1e   :  { %p1810_p13 = por %p1809_p12, %p1808_p11 }
  0x20   :  { %p1811_p0 = pnand %p1810_p13, %p1804_p10 }
  0x22   :  { %1814 = shalt.err (!%p1811_p0)
}
  0x23   :  { %s1888_s6 = smov 16   ;;  %s1889_s29 = smov 1  }
  0x24   :  { %36 = dma.hbm_to_vmem [thread:$0]  %s2271_s1, 32, %s31_s27, [#allocation3], %s1888_s6, %s1888_s6, %s1889_s29  }
  0x25   :  { %s1890_s17 = smov [#allocation7]   ;;  %s1891_s16 = smov [#allocation10]  }
  0x26   :  { %s61_s8 = sshll.u32 %s1890_s17, 4  ;;  %s83_s18 = sshll.u32 %s1891_s16, 4  ;;  %s62_s8 = int_to_ptr.vmem [resolvable:$true] %s61_s8  ;;  %s84_s18 = int_to_ptr.vmem [resolvable:$true] %s83_s18 }
  0x27   :  { %s1823_s19 = scalar_lea.vmem %s62_s8, 16  ;;  %s1827_s20 = scalar_lea.vmem %s62_s8, 32 }
  0x28   :  { %p1824_p1 = scmp.ne.s32.totalorder %s62_s8, %s1823_s19  ;;  %p1828_p2 = scmp.lt.s32.totalorder %s62_s8, %s62_s8 }
  0x29   :  { %p1829_p3 = scmp.lt.s32.totalorder %s1827_s20, %s1823_s19 }
  0x2b   :  { %p1830_p4 = por %p1829_p3, %p1828_p2 }
  0x2d   :  { %p1831_p5 = pnand %p1830_p4, %p1824_p1 }
  0x2f   :  { %1834 = shalt.err (!%p1831_p5)
}
  0x30   :  { %64 = dma.hbm_to_vmem [thread:$0]  %s2277_s7, 16, %s62_s8, [#allocation6]  }
  0x31   :  { %s1843_s24 = scalar_lea.vmem %s84_s18, 16  ;;  %s1847_s1 = scalar_lea.vmem %s84_s18, 32 }
  0x32   :  { %p1844_p6 = scmp.ne.s32.totalorder %s84_s18, %s1843_s24  ;;  %p1848_p7 = scmp.lt.s32.totalorder %s84_s18, %s84_s18 }
  0x33   :  { %p1849_p8 = scmp.lt.s32.totalorder %s1847_s1, %s1843_s24 }
  0x35   :  { %p1850_p9 = por %p1849_p8, %p1848_p7 }
  0x37   :  { %p1851_p10 = pnand %p1850_p9, %p1844_p6 }
  0x39   :  { %1854 = shalt.err (!%p1851_p10)
}
  0x3a   :  { %86 = dma.hbm_to_vmem [thread:$0]  %s2279_s9, 16, %s84_s18, [#allocation9]  }
  0x3b   :  { %1875 = dma.done.wait [#allocation3], 32  }
  0x3c   :  { %1876 = vsyncadd [#allocation3], 4294967264 }
  0x3d   :  { %1877 = dma.done.wait [#allocation6], 32  }
  0x3e   :  { %1878 = vsyncadd [#allocation6], 4294967264 }
  0x3f   :  { %1879 = dma.done.wait [#allocation9], 272  }
  0x40   :  { %1880 = vsyncadd [#allocation9], 4294967024  ;;  %v1892_v0 = vmov 0.0   ;;  %vm1893_vm0 = vmmov 0   ;;  %v1705_v1 = vld [vmem:[%s2272_s2 + $0x8] sm:$0xff]   ;;  %v1706_v2 = vld [vmem:[%s2272_s2] sm:$0xff]  }
  0x41   :  { %1533 = vmatprep.subr.bf16.mxu0 %v1892_v0  ;;  %1537 = vmatprep.mubr.msk.bf16.mxu0 %vm1893_vm0, %v1892_v0  ;;  %v2017_v3 = vld [vmem:[%s2270_s0] sm:$0xff]  ;;  %v2022_v4 = vld [vmem:[%s2270_s0 + $0x8] sm:$0xff]  ;;  %vm139_vm1 = vcmask 261120   ;;  %s1894_s0 = smov 96   ;;  %s1895_s16 = smov 88   ;;  %vm201_vm2 = vcmask 64512  }
  0x42   :  { %1541 = vmatprep.subr.bf16.mxu1 %v1892_v0  ;;  %1543 = vmatprep.mubr.msk.bf16.mxu1 %vm1893_vm0, %v1892_v0  ;;  %v115_v5 = vpack.c.bf16 %v2022_v4, %v2017_v3  ;;  %v1447_v6 = vld [vmem:[%s2273_s3] ss:$0 sm:$0xff]  ;;  %s1896_s3 = smov 120   ;;  %vm322_vm3 = vcmask 1043456   ;;  %v2063_v25 = vld [vmem:[#allocation2 + $0x1] ss:$0 sm:$0xff] }
  0x43   :  { %1534 = vmatpush3.bf16.msra.mxu0 %v1705_v1  ;;  %v2060_v21 = vld [vmem:[#allocation2] ss:$0 sm:$0xff]  ;;  %s1898_s18 = smov 80   ;;  %s1899_s19 = smov 112   ;;  %vm1104_vm4 = vcmask 130048   ;;  %vm1107_vm5 = vcmask 195584  }
  0x44   :  { %1535 = vmatprep.subr.bf16.mxu0 %v1892_v0  ;;  %s1900_s20 = smov 48   ;;  %s1901_s21 = smov 72   ;;  %vm1335_vm6 = vcmask 523264  }
  0x45   :  { %s1902_s23 = smov 104   ;;  %s1903_s24 = smov 40  }
  0x46   :  { %s1904_s1 = smov 8  }
  0x47   :  { %1536 = vmatpush3.bf16.msra.mxu0 %v1706_v2 }
  0x48   :  { %1547 = vmatprep.subr.bf16.mxu0 %v1892_v0 }
  0x4a   :  { %1538 = vmatmul.mubr.msk.bf16.vlgmr.msra.gmra.mxu0 %vm139_vm1, %v115_v5 }
  0x4b   :  { %1549 = vmatprep.mubr.msk.bf16.mxu0 %vm1893_vm0, %v1892_v0 }
 0x10a   :  { %v177_v7 = vpop.f32.mrf.mxu0 }
 0x10b   :  { %v178_v8 = vadd.f32 %v1447_v6, %v177_v7 }
 0x10c   :  { %v1539_v9 = vpop.f32.mrf.mxu0 }
 0x10d   :  { %v2034_v10 = vpack.c.bf16 %v178_v8, %v178_v8 }
 0x10e   :  { %v180_v11 = vpop.f32.mrf.mxu0 }
 0x10f   :  { %v181_v12 = vadd.f32 %v1447_v6, %v180_v11  ;;  %199 = vrot.lane.b32.xlu0 %v2034_v10, %s1894_s0 }
 0x110   :  { %v1540_v13 = vpop.f32.mrf.mxu0 }
 0x111   :  { %v2037_v14 = vpack.c.bf16 %v181_v12, %v181_v12 }
 0x113   :  { %249 = vrot.lane.b32.xlu0 %v2037_v14, %s1894_s0 }
 0x117   :  { %317 = vrot.lane.b32.xlu0 %v2034_v10, %s1885_s22 }
 0x11b   :  { %420 = vrot.lane.b32.xlu0 %v2034_v10, %s1895_s16 }
 0x11f   :  { %470 = vrot.lane.b32.xlu0 %v2037_v14, %s1895_s16 }
 0x123   :  { %418 = vrot.lane.b32.xlu0 %v2034_v10, %s1896_s3 }
 0x127   :  { %468 = vrot.lane.b32.xlu0 %v2037_v14, %s1896_s3 }
 0x181   :  { %v200_v15 = vpop.permute.xlu0 %199 }
 0x182   :  { %v206_v16 = vsel %vm201_vm2, %v200_v15, 0 }
 0x183   :  { %1542 = vmatpush3.bf16.xpose.msra.mxu1 %v206_v16 }
 0x184   :  { %1553 = vmatprep.subr.bf16.mxu1 %v1892_v0 }
 0x185   :  { %v250_v17 = vpop.permute.xlu0 %249 }
 0x186   :  { %v255_v18 = vsel %vm201_vm2, %v250_v17, 0 }
 0x187   :  { %1548 = vmatpush3.bf16.xpose.msra.mxu0 %v255_v18 }
 0x188   :  { %1559 = vmatprep.subr.bf16.mxu0 %v1892_v0 }
 0x189   :  { %v318_v19 = vpop.permute.xlu0 %317 }
 0x18a   :  { %v324_v20 = vsel %vm322_vm3, %v318_v19, 0  ;;  %1544 = vmatmul.mubr.msk.bf16.vlgmr.msra.gmra.mxu1 %vm201_vm2, %v2034_v10 }
 0x18b   :  { %1554 = vmatpush3.bf16.msra.mxu1 %v324_v20  ;;  %1555 = vmatprep.mubr.msk.bf16.mxu1 %vm1893_vm0, %v1892_v0 }
 0x18c   :  { %1565 = vmatprep.subr.bf16.mxu1 %v1892_v0 }
 0x18d   :  { %v421_v43 = vpop.permute.xlu0 %420 }
 0x18e   :  { %1550 = vmatmul.mubr.msk.bf16.vlgmr.msra.gmra.mxu0 %vm201_vm2, %v2037_v14  ;;  %v426_v47 = vsel %vm201_vm2, %v421_v43, 0 }
 0x18f   :  { %1561 = vmatprep.mubr.msk.bf16.mxu0 %vm1893_vm0, %v1892_v0 }
 0x191   :  { %v471_v46 = vpop.permute.xlu0 %470 }
 0x192   :  { %v476_v50 = vsel %vm201_vm2, %v471_v46, 0 }
 0x195   :  { %v419_v51 = vpop.permute.xlu0 %418 }
 0x199   :  { %v469_v52 = vpop.permute.xlu0 %468 }
 0x24a   :  { %v242_v22 = vpop.f32.mrf.mxu1 }
 0x24b   :  { %v243_v23 = vadd.f32 %v2060_v21, %v242_v22 }
 0x24c   :  { %v1545_v24 = vpop.f32.mrf.mxu1 }
 0x24d   :  { %v297_v26 = vsel %vm201_vm2, %v243_v23, -inf }
 0x24e   :  { %298 = vmax.xlane.f32.xlu1 %v297_v26  ;;  %v245_v27 = vpop.f32.mrf.mxu1  ;;  %v291_v28 = vpop.f32.mrf.mxu0 }
 0x24f   :  { %v292_v29 = vadd.f32 %v2063_v25, %v291_v28 }
 0x250   :  { %v1546_v30 = vpop.f32.mrf.mxu1  ;;  %v1551_v31 = vpop.f32.mrf.mxu0 }
 0x251   :  { %v300_v32 = vsel %vm201_vm2, %v292_v29, -inf }
 0x252   :  { %301 = vmax.xlane.f32.xlu1 %v300_v32  ;;  %v294_v33 = vpop.f32.mrf.mxu0 }
 0x254   :  { %v1552_v34 = vpop.f32.mrf.mxu0 }
 0x263   :  { %366 = vrot.lane.b32.xlu1 %v2037_v14, %s1885_s22  ;;  %s1897_s22 = smov 56  }
 0x2d7   :  { %v299_v35 = vpop.xlane.xlu1 %298 }
 0x2d8   :  { %v303_v36 = vsub.f32 %v243_v23, %v299_v35 }
 0x2da   :  { %v305_v37 = vmul.f32 1.442695, %v303_v36 }
 0x2db   :  { %v302_v38 = vpop.xlane.xlu1 %301 }
 0x2dc   :  { %1715 = vpow2.f32 %v305_v37  ;;  %v304_v39 = vsub.f32 %v292_v29, %v302_v38 }
 0x2de   :  { %v307_v40 = vmul.f32 1.442695, %v304_v39 }
 0x2df   :  { %v367_v41 = vpop.permute.xlu1 %366 }
 0x2e0   :  { %1717 = vpow2.f32 %v307_v40  ;;  %v372_v42 = vsel %vm322_vm3, %v367_v41, 0 }
 0x2e1   :  { %1560 = vmatpush3.bf16.msra.mxu0 %v372_v42 }
 0x2e2   :  { %1571 = vmatprep.subr.bf16.mxu0 %v1892_v0 }
 0x2e9   :  { %v2072_v44 = vpop.eup %1715 }
 0x2ea   :  { %v315_v45 = vpack.c.bf16 %v2072_v44, %v2072_v44 }
 0x2ec   :  { %1556 = vmatmul.mubr.msk.bf16.vlgmr.msra.gmra.mxu1 %vm201_vm2, %v315_v45 }
 0x2ed   :  { %v2078_v48 = vpop.eup %1717  ;;  %1566 = vmatpush3.bf16.xpose.msra.mxu1 %v426_v47  ;;  %1567 = vmatprep.mubr.msk.bf16.mxu1 %vm1893_vm0, %v1892_v0 }
 0x2ee   :  { %v316_v49 = vpack.c.bf16 %v2078_v48, %v2078_v48  ;;  %1577 = vmatprep.subr.bf16.mxu1 %v1892_v0 }
 0x2f0   :  { %1562 = vmatmul.mubr.msk.bf16.vlgmr.msra.gmra.mxu0 %vm201_vm2, %v316_v49 }
 0x2f1   :  { %1572 = vmatpush3.bf16.xpose.msra.mxu0 %v476_v50  ;;  %1573 = vmatprep.mubr.msk.bf16.mxu0 %vm1893_vm0, %v1892_v0 }
 0x2f2   :  { %1583 = vmatprep.subr.bf16.mxu0 %v1892_v0 }
 0x2f4   :  { %1568 = vmatmul.mubr.msk.bf16.vlgmr.msra.gmra.mxu1 %vm201_vm2, %v419_v51 }
 0x2f5   :  { %1579 = vmatprep.mubr.msk.bf16.mxu1 %vm1893_vm0, %v1892_v0 }
 0x2f8   :  { %1574 = vmatmul.mubr.msk.bf16.vlgmr.msra.gmra.mxu0 %vm201_vm2, %v469_v52 }
 0x2f9   :  { %1585 = vmatprep.mubr.msk.bf16.mxu0 %vm1893_vm0, %v1892_v0 }
 0x3ac   :  { %v2096_v53 = vpop.f32.mrf.mxu1 }
 0x3ae   :  { %v1557_v54 = vpop.f32.mrf.mxu1 }
 0x3b0   :  { %v363_v55 = vpop.f32.mrf.mxu1  ;;  %v2098_v56 = vpop.f32.mrf.mxu0 }
 0x3b2   :  { %v1558_v57 = vpop.f32.mrf.mxu1  ;;  %v1563_v58 = vpop.f32.mrf.mxu0 }
 0x3b4   :  { %v411_v59 = vpop.f32.mrf.mxu0  ;;  %v462_v60 = vpop.f32.mrf.mxu1 }
 0x3b5   :  { %v463_v61 = vadd.f32 %v2060_v21, %v462_v60 }
 0x3b6   :  { %v1564_v62 = vpop.f32.mrf.mxu0  ;;  %v1569_v63 = vpop.f32.mrf.mxu1 }
 0x3b7   :  { %v518_v1 = vsel %vm201_vm2, %v463_v61, -inf }
 0x3b8   :  { %v465_v2 = vpop.f32.mrf.mxu1  ;;  %519 = vmax.xlane.f32.xlu1 %v518_v1  ;;  %v512_v5 = vpop.f32.mrf.mxu0 }
 0x3b9   :  { %v513_v6 = vadd.f32 %v2063_v25, %v512_v5 }
 0x3ba   :  { %v1570_v7 = vpop.f32.mrf.mxu1  ;;  %v1575_v8 = vpop.f32.mrf.mxu0 }
 0x3bb   :  { %v521_v9 = vsel %vm201_vm2, %v513_v6, -inf }
 0x3bc   :  { %522 = vmax.xlane.f32.xlu0 %v521_v9  ;;  %v515_v11 = vpop.f32.mrf.mxu0 }
 0x3be   :  { %v1576_v12 = vpop.f32.mrf.mxu0 }
 0x3c9   :  { %586 = vrot.lane.b32.xlu1 %v2037_v14, %s1897_s22 }
 0x3cd   :  { %640 = vrot.lane.b32.xlu1 %v2034_v10, %s1898_s18 }
 0x3d1   :  { %638 = vrot.lane.b32.xlu1 %v2034_v10, %s1899_s19 }
 0x3d2   :  { %538 = vrot.lane.b32.xlu0 %v2034_v10, %s1897_s22 }
 0x3d6   :  { %690 = vrot.lane.b32.xlu0 %v2037_v14, %s1898_s18  ;;  %s1906_s18 = smov [#allocation11]  }
 0x3da   :  { %688 = vrot.lane.b32.xlu0 %v2037_v14, %s1899_s19  ;;  %s1433_s19 = sshll.u32 %s1906_s18, 4  ;;  %s1434_s19 = int_to_ptr.vmem [resolvable:$true] %s1433_s19 }
 0x3db   :  { %p1860_p12 = scmp.lt.s32.totalorder %s1434_s19, %s1434_s19 }
 0x441   :  { %v520_v13 = vpop.xlane.xlu1 %519 }
 0x442   :  { %v524_v15 = vsub.f32 %v463_v61, %v520_v13 }
 0x444   :  { %v526_v16 = vmul.f32 1.442695, %v524_v15 }
 0x445   :  { %v587_v17 = vpop.permute.xlu1 %586  ;;  %v523_v18 = vpop.xlane.xlu0 %522 }
 0x446   :  { %1719 = vpow2.f32 %v526_v16  ;;  %v592_v19 = vsel %vm322_vm3, %v587_v17, 0  ;;  %v525_v20 = vsub.f32 %v513_v6, %v523_v18 }
 0x447   :  { %1584 = vmatpush3.bf16.msra.mxu0 %v592_v19 }
 0x448   :  { %v528_v22 = vmul.f32 1.442695, %v525_v20  ;;  %1595 = vmatprep.subr.bf16.mxu0 %v1892_v0 }
 0x449   :  { %v539_v23 = vpop.permute.xlu0 %538  ;;  %v641_v27 = vpop.permute.xlu1 %640 }
 0x44a   :  { %1721 = vpow2.f32 %v528_v22  ;;  %v544_v24 = vsel %vm322_vm3, %v539_v23, 0  ;;  %v646_v29 = vsel %vm201_vm2, %v641_v27, 0 }
 0x44b   :  { %1578 = vmatpush3.bf16.msra.mxu1 %v544_v24 }
 0x44c   :  { %1589 = vmatprep.subr.bf16.mxu1 %v1892_v0 }
 0x44d   :  { %v691_v31 = vpop.permute.xlu0 %690  ;;  %v639_v34 = vpop.permute.xlu1 %638 }
 0x44e   :  { %v696_v33 = vsel %vm201_vm2, %v691_v31, 0 }
 0x451   :  { %v689_v35 = vpop.permute.xlu0 %688 }
 0x453   :  { %v2114_v26 = vpop.eup %1719 }
 0x454   :  { %v536_v28 = vpack.c.bf16 %v2114_v26, %v2114_v26 }
 0x456   :  { %1580 = vmatmul.mubr.msk.bf16.vlgmr.msra.gmra.mxu1 %vm201_vm2, %v536_v28 }
 0x457   :  { %v2120_v30 = vpop.eup %1721  ;;  %1590 = vmatpush3.bf16.xpose.msra.mxu1 %v646_v29  ;;  %1591 = vmatprep.mubr.msk.bf16.mxu1 %vm1893_vm0, %v1892_v0 }
 0x458   :  { %v537_v32 = vpack.c.bf16 %v2120_v30, %v2120_v30  ;;  %1601 = vmatprep.subr.bf16.mxu1 %v1892_v0 }
 0x45a   :  { %1586 = vmatmul.mubr.msk.bf16.vlgmr.msra.gmra.mxu0 %vm201_vm2, %v537_v32 }
 0x45b   :  { %1596 = vmatpush3.bf16.xpose.msra.mxu0 %v696_v33  ;;  %1597 = vmatprep.mubr.msk.bf16.mxu0 %vm1893_vm0, %v1892_v0 }
 0x45c   :  { %1607 = vmatprep.subr.bf16.mxu0 %v1892_v0 }
 0x45e   :  { %1592 = vmatmul.mubr.msk.bf16.vlgmr.msra.gmra.mxu1 %vm201_vm2, %v639_v34 }
 0x45f   :  { %1603 = vmatprep.mubr.msk.bf16.mxu1 %vm1893_vm0, %v1892_v0 }
 0x462   :  { %1598 = vmatmul.mubr.msk.bf16.vlgmr.msra.gmra.mxu0 %vm201_vm2, %v689_v35 }
 0x463   :  { %1609 = vmatprep.mubr.msk.bf16.mxu0 %vm1893_vm0, %v1892_v0 }
 0x516   :  { %v2138_v36 = vpop.f32.mrf.mxu1 }
 0x518   :  { %v1581_v37 = vpop.f32.mrf.mxu1 }
 0x51a   :  { %v583_v38 = vpop.f32.mrf.mxu1  ;;  %v2140_v39 = vpop.f32.mrf.mxu0 }
 0x51c   :  { %v1582_v40 = vpop.f32.mrf.mxu1  ;;  %v1587_v41 = vpop.f32.mrf.mxu0 }
 0x51e   :  { %v631_v42 = vpop.f32.mrf.mxu0  ;;  %v682_v43 = vpop.f32.mrf.mxu1 }
 0x51f   :  { %v683_v45 = vadd.f32 %v2060_v21, %v682_v43 }
 0x520   :  { %v1588_v46 = vpop.f32.mrf.mxu0  ;;  %v1593_v47 = vpop.f32.mrf.mxu1 }
 0x521   :  { %v738_v49 = vsel %vm201_vm2, %v683_v45, -inf }
 0x522   :  { %739 = vmax.xlane.f32.xlu1 %v738_v49  ;;  %v685_v50 = vpop.f32.mrf.mxu1  ;;  %v732_v51 = vpop.f32.mrf.mxu0 }
 0x523   :  { %v733_v52 = vadd.f32 %v2063_v25, %v732_v51 }
 0x524   :  { %v1594_v54 = vpop.f32.mrf.mxu1  ;;  %v1599_v55 = vpop.f32.mrf.mxu0 }
 0x525   :  { %v741_v57 = vsel %vm201_vm2, %v733_v52, -inf }
 0x526   :  { %742 = vmax.xlane.f32.xlu0 %v741_v57  ;;  %v735_v58 = vpop.f32.mrf.mxu0 }
 0x528   :  { %v1600_v59 = vpop.f32.mrf.mxu0 }
 0x533   :  { %806 = vrot.lane.b32.xlu1 %v2037_v14, %s1900_s20 }
 0x537   :  { %860 = vrot.lane.b32.xlu1 %v2034_v10, %s1901_s21 }
 0x53b   :  { %858 = vrot.lane.b32.xlu1 %v2034_v10, %s1902_s23 }
 0x53c   :  { %758 = vrot.lane.b32.xlu0 %v2034_v10, %s1900_s20  ;;  %s1855_s20 = scalar_lea.vmem %s1434_s19, 256 }
 0x53d   :  { %p1856_p11 = scmp.ne.s32.totalorder %s1434_s19, %s1855_s20  ;;  %p1861_p13 = scmp.lt.s32.totalorder %s1855_s20, %s1855_s20 }
 0x53f   :  { %p1862_p0 = por %p1861_p13, %p1860_p12 }
 0x540   :  { %910 = vrot.lane.b32.xlu0 %v2037_v14, %s1901_s21 }
 0x541   :  { %p1863_p1 = pnand %p1862_p0, %p1856_p11 }
 0x544   :  { %908 = vrot.lane.b32.xlu0 %v2037_v14, %s1902_s23 }
 0x5ab   :  { %v740_v60 = vpop.xlane.xlu1 %739 }
 0x5ac   :  { %v744_v61 = vsub.f32 %v683_v45, %v740_v60 }
 0x5ae   :  { %v746_v62 = vmul.f32 1.442695, %v744_v61 }
 0x5af   :  { %v807_v63 = vpop.permute.xlu1 %806  ;;  %v743_v1 = vpop.xlane.xlu0 %742 }
 0x5b0   :  { %1723 = vpow2.f32 %v746_v62  ;;  %v812_v2 = vsel %vm322_vm3, %v807_v63, 0  ;;  %v745_v5 = vsub.f32 %v733_v52, %v743_v1  ;;  %v309_v63 = vsel %vm201_vm2, %v2072_v44, 0.0 }
 0x5b1   :  { %1608 = vmatpush3.bf16.msra.mxu0 %v812_v2 }
 0x5b2   :  { %v748_v6 = vmul.f32 1.442695, %v745_v5  ;;  %1619 = vmatprep.subr.bf16.mxu0 %v1892_v0  ;;  %v312_v5 = vsel %vm201_vm2, %v2078_v48, 0.0 }
 0x5b3   :  { %v759_v7 = vpop.permute.xlu0 %758  ;;  %v861_v11 = vpop.permute.xlu1 %860 }
 0x5b4   :  { %1725 = vpow2.f32 %v748_v6  ;;  %v764_v8 = vsel %vm322_vm3, %v759_v7, 0  ;;  %v866_v13 = vsel %vm201_vm2, %v861_v11, 0 }
 0x5b5   :  { %1602 = vmatpush3.bf16.msra.mxu1 %v764_v8 }
 0x5b6   :  { %1613 = vmatprep.subr.bf16.mxu1 %v1892_v0 }
 0x5b7   :  { %v911_v16 = vpop.permute.xlu0 %910  ;;  %v859_v19 = vpop.permute.xlu1 %858 }
 0x5b8   :  { %v916_v18 = vsel %vm201_vm2, %v911_v16, 0 }
 0x5bb   :  { %v909_v20 = vpop.permute.xlu0 %908 }
 0x5bd   :  { %v1724_v9 = vpop.eup %1723 }
 0x5be   :  { %v756_v12 = vpack.c.bf16 %v1724_v9, %v1724_v9  ;;  %v750_v50 = vsel %vm201_vm2, %v1724_v9, 0.0 }
 0x5c0   :  { %1604 = vmatmul.mubr.msk.bf16.vlgmr.msra.gmra.mxu1 %vm201_vm2, %v756_v12 }
 0x5c1   :  { %v1726_v15 = vpop.eup %1725  ;;  %1614 = vmatpush3.bf16.xpose.msra.mxu1 %v866_v13  ;;  %1615 = vmatprep.mubr.msk.bf16.mxu1 %vm1893_vm0, %v1892_v0 }
 0x5c2   :  { %v757_v17 = vpack.c.bf16 %v1726_v15, %v1726_v15  ;;  %1625 = vmatprep.subr.bf16.mxu1 %v1892_v0  ;;  %v753_v49 = vsel %vm201_vm2, %v1726_v15, 0.0 }
 0x5c4   :  { %1610 = vmatmul.mubr.msk.bf16.vlgmr.msra.gmra.mxu0 %vm201_vm2, %v757_v17 }
 0x5c5   :  { %1620 = vmatpush3.bf16.xpose.msra.mxu0 %v916_v18  ;;  %1621 = vmatprep.mubr.msk.bf16.mxu0 %vm1893_vm0, %v1892_v0 }
 0x5c6   :  { %1631 = vmatprep.subr.bf16.mxu0 %v1892_v0 }
 0x5c8   :  { %1616 = vmatmul.mubr.msk.bf16.vlgmr.msra.gmra.mxu1 %vm201_vm2, %v859_v19 }
 0x5c9   :  { %1627 = vmatprep.mubr.msk.bf16.mxu1 %vm1893_vm0, %v1892_v0 }
 0x5cc   :  { %1622 = vmatmul.mubr.msk.bf16.vlgmr.msra.gmra.mxu0 %vm201_vm2, %v909_v20  ;;  %v1707_v20 = vld [vmem:[%s2274_s4 + $0x8] sm:$0xff]  }
 0x5cd   :  { %1633 = vmatprep.mubr.msk.bf16.mxu0 %vm1893_vm0, %v1892_v0 }
 0x680   :  { %v2172_v22 = vpop.f32.mrf.mxu1 }
 0x682   :  { %v1605_v23 = vpop.f32.mrf.mxu1 }
 0x684   :  { %v803_v24 = vpop.f32.mrf.mxu1  ;;  %v2174_v27 = vpop.f32.mrf.mxu0 }
 0x686   :  { %v1606_v28 = vpop.f32.mrf.mxu1  ;;  %v1611_v29 = vpop.f32.mrf.mxu0 }
 0x688   :  { %v851_v31 = vpop.f32.mrf.mxu0  ;;  %v902_v32 = vpop.f32.mrf.mxu1 }
 0x689   :  { %v903_v33 = vadd.f32 %v2060_v21, %v902_v32  ;;  %v530_v21 = vsel %vm201_vm2, %v2114_v26, 0.0 }
 0x68a   :  { %v1612_v34 = vpop.f32.mrf.mxu0  ;;  %v1617_v35 = vpop.f32.mrf.mxu1 }
 0x68b   :  { %v958_v37 = vsel %vm201_vm2, %v903_v33, -inf }
 0x68c   :  { %959 = vmax.xlane.f32.xlu1 %v958_v37  ;;  %v905_v38 = vpop.f32.mrf.mxu1  ;;  %v952_v40 = vpop.f32.mrf.mxu0 }
 0x68d   :  { %v953_v41 = vadd.f32 %v2063_v25, %v952_v40  ;;  %v533_v25 = vsel %vm201_vm2, %v2120_v30, 0.0 }
 0x68e   :  { %v1618_v42 = vpop.f32.mrf.mxu1  ;;  %v1623_v43 = vpop.f32.mrf.mxu0 }
 0x68f   :  { %v961_v45 = vsel %vm201_vm2, %v953_v41, -inf }
 0x690   :  { %962 = vmax.xlane.f32.xlu0 %v961_v45  ;;  %v955_v46 = vpop.f32.mrf.mxu0 }
 0x692   :  { %v1624_v47 = vpop.f32.mrf.mxu0 }
 0x69d   :  { %1026 = vrot.lane.b32.xlu1 %v2037_v14, %s1903_s24 }
 0x6a6   :  { %978 = vrot.lane.b32.xlu0 %v2034_v10, %s1903_s24 }
 0x6c1   :  { %531 = vadd.xlane.f32.xlu1 %v530_v21 }
 0x6c5   :  { %754 = vadd.xlane.f32.xlu1 %v753_v49  ;;  %534 = vadd.xlane.f32.xlu0 %v533_v25 }
 0x6c9   :  { %751 = vadd.xlane.f32.xlu0 %v750_v50 }
 0x715   :  { %v960_v51 = vpop.xlane.xlu1 %959 }
 0x716   :  { %v964_v52 = vsub.f32 %v903_v33, %v960_v51 }
 0x718   :  { %v966_v54 = vmul.f32 1.442695, %v964_v52 }
 0x719   :  { %v1027_v14 = vpop.permute.xlu1 %1026  ;;  %v963_v55 = vpop.xlane.xlu0 %962 }
 0x71a   :  { %1727 = vpow2.f32 %v966_v54  ;;  %v1032_v10 = vsel %vm322_vm3, %v1027_v14, 0  ;;  %v965_v26 = vsub.f32 %v953_v41, %v963_v55 }
 0x71b   :  { %1632 = vmatpush3.bf16.msra.mxu0 %v1032_v10 }
 0x71c   :  { %v968_v57 = vmul.f32 1.442695, %v965_v26  ;;  %1645 = vmatprep.subr.bf16.mxu0 %v1892_v0 }
 0x71d   :  { %v979_v58 = vpop.permute.xlu0 %978 }
 0x71e   :  { %1729 = vpow2.f32 %v968_v57  ;;  %v984_v30 = vsel %vm322_vm3, %v979_v58, 0 }
 0x71f   :  { %1626 = vmatpush3.bf16.msra.mxu1 %v984_v30 }
 0x720   :  { %1637 = vmatprep.subr.bf16.mxu1 %v1892_v0 }
 0x727   :  { %v1728_v59 = vpop.eup %1727 }
 0x728   :  { %v970_v60 = vsel %vm201_vm2, %v1728_v59, 0.0  ;;  %v976_v61 = vpack.c.bf16 %v1728_v59, %v1728_v59 }
 0x729   :  { %971 = vadd.xlane.f32.xlu0 %v970_v60 }
 0x72a   :  { %1628 = vmatmul.mubr.msk.bf16.vlgmr.msra.gmra.mxu1 %vm201_vm2, %v976_v61 }
 0x72b   :  { %v1730_v62 = vpop.eup %1729  ;;  %1641 = vmatprep.mubr.msk.bf16.mxu1 %vm1893_vm0, %v1892_v0  ;;  %1638 = vmatpush3.bf16.msra.mxu1 %v1707_v20 }
 0x72c   :  { %v973_v1 = vsel %vm201_vm2, %v1730_v62, 0.0  ;;  %v977_v2 = vpack.c.bf16 %v1730_v62, %v1730_v62  ;;  %1639 = vmatprep.subr.bf16.mxu1 %v1892_v0 }
 0x72d   :  { %310 = vadd.xlane.f32.xlu0 %v309_v63  ;;  %974 = vadd.xlane.f32.xlu1 %v973_v1 }
 0x72e   :  { %1634 = vmatmul.mubr.msk.bf16.vlgmr.msra.gmra.mxu0 %vm201_vm2, %v977_v2 }
 0x72f   :  { %1649 = vmatprep.mubr.msk.bf16.mxu0 %vm1893_vm0, %v1892_v0 }
 0x731   :  { %313 = vadd.xlane.f32.xlu1 %v312_v5 }
 0x74a   :  { %v532_v6 = vpop.xlane.xlu1 %531 }
 0x74b   :  { %1731 = vrcp.f32 %v532_v6 }
 0x74e   :  { %v755_v7 = vpop.xlane.xlu1 %754  ;;  %v535_v8 = vpop.xlane.xlu0 %534 }
 0x74f   :  { %1733 = vrcp.f32 %v535_v8 }
 0x750   :  { %1735 = vrcp.f32 %v755_v7 }
 0x752   :  { %v752_v44 = vpop.xlane.xlu0 %751 }
 0x753   :  { %1737 = vrcp.f32 %v752_v44 }
 0x758   :  { %v1732_v9 = vpop.eup %1731 }
 0x759   :  { %v636_v13 = vmul.f32 %v1732_v9, %v2138_v36 }
 0x75c   :  { %v1734_v11 = vpop.eup %1733 }
 0x75d   :  { %v1736_v12 = vpop.eup %1735  ;;  %v637_v15 = vmul.f32 %v1734_v11, %v2140_v39 }
 0x75e   :  { %v857_v18 = vmul.f32 %v1736_v12, %v2174_v27 }
 0x75f   :  { %v1690_v17 = vpack.i.bf16 %v637_v15, %v636_v13 }
 0x760   :  { %v1738_v16 = vpop.eup %1737 }
 0x761   :  { %v856_v48 = vmul.f32 %v1738_v16, %v2172_v22  ;;  %1691 = vrot.lane.b32.xlu0 %v1690_v17, %s1904_s1  ;;  %v1708_v22 = vld [vmem:[%s2274_s4] sm:$0xff]  }
 0x762   :  { %1640 = vmatpush3.bf16.msra.mxu1 %v1708_v22 }
 0x763   :  { %v1695_v19 = vpack.i.bf16 %v857_v18, %v856_v48  ;;  %1653 = vmatprep.subr.bf16.mxu1 %v1892_v0  ;;  %v1709_v18 = vld [vmem:[#allocation8 + $0x8] sm:$0xff]  }
 0x764   :  { %1646 = vmatpush3.bf16.msra.mxu0 %v1709_v18 }
 0x765   :  { %1696 = vrot.lane.b32.xlu1 %v1695_v19, %s1888_s6  ;;  %s1905_s6 = smov 24   ;;  %1647 = vmatprep.subr.bf16.mxu0 %v1892_v0  ;;  %v1711_v19 = vld [vmem:[%s2280_s10 + $0x18] sm:$0xff]  }
 0x7b2   :  { %v972_v36 = vpop.xlane.xlu0 %971 }
 0x7b3   :  { %1739 = vrcp.f32 %v972_v36 }
 0x7b6   :  { %v975_v39 = vpop.xlane.xlu1 %974  ;;  %v311_v41 = vpop.xlane.xlu0 %310 }
 0x7b7   :  { %1741 = vrcp.f32 %v975_v39 }
 0x7b8   :  { %1743 = vrcp.f32 %v311_v41  ;;  %v1712_v41 = vld [vmem:[%s2280_s10 + $0x10] sm:$0xff]  }
 0x7ba   :  { %v314_v42 = vpop.xlane.xlu1 %313 }
 0x7bb   :  { %1745 = vrcp.f32 %v314_v42  ;;  %v1713_v42 = vld [vmem:[%s2280_s10 + $0x8] sm:$0xff]  }
 0x7c0   :  { %v1740_v27 = vpop.eup %1739 }
 0x7c4   :  { %v1742_v28 = vpop.eup %1741 }
 0x7c5   :  { %v1744_v45 = vpop.eup %1743 }
 0x7c6   :  { %v416_v51 = vmul.f32 %v1744_v45, %v2096_v53  ;;  %v1469_v53 = vld [vmem:[%s2275_s5] ss:$0 sm:$0xff]  ;;  %v1475_v45 = vld [vmem:[#allocation10] ss:$0 sm:$0xff] }
 0x7c8   :  { %v1746_v47 = vpop.eup %1745 }
 0x7c9   :  { %v417_v52 = vmul.f32 %v1746_v47, %v2098_v56 }
 0x7d3   :  { %v1692_v43 = vpop.permute.xlu0 %1691 }
 0x7d4   :  { %v1694_v21 = vunpack.i.h.bf16 %v1692_v43  ;;  %v1693_v49 = vunpack.i.l.bf16 %v1692_v43  ;;  %v1714_v43 = vld [vmem:[%s2280_s10] sm:$0xff]  }
 0x7d6   :  { %v1103_v14 = vsel %vm201_vm2, %v417_v52, %v1694_v21  ;;  %v1102_v55 = vsel %vm201_vm2, %v416_v51, %v1693_v49 }
 0x7d7   :  { %v1697_v46 = vpop.permute.xlu1 %1696 }
 0x7d8   :  { %v1699_v25 = vunpack.i.h.bf16 %v1697_v46  ;;  %v1698_v50 = vunpack.i.l.bf16 %v1697_v46 }
 0x7da   :  { %v1105_v57 = vsel %vm1104_vm4, %v1102_v55, %v1698_v50  ;;  %v1106_v58 = vsel %vm1104_vm4, %v1103_v14, %v1699_v25 }
 0x7ea   :  { %v1020_v23 = vpop.f32.mrf.mxu1 }
 0x7eb   :  { %v1076_v32 = vmul.f32 %v1740_v27, %v1020_v23 }
 0x7ec   :  { %v1629_v24 = vpop.f32.mrf.mxu1 }
 0x7ee   :  { %v1023_v29 = vpop.f32.mrf.mxu1  ;;  %v1068_v31 = vpop.f32.mrf.mxu0 }
 0x7ef   :  { %v1077_v33 = vmul.f32 %v1742_v28, %v1068_v31  ;;  %v1473_v29 = vld [vmem:[#allocation5] ss:$0 sm:$0xff] }
 0x7f0   :  { %v1630_v34 = vpop.f32.mrf.mxu1  ;;  %v1635_v35 = vpop.f32.mrf.mxu0 }
 0x7f1   :  { %v1700_v37 = vpack.i.bf16 %v1077_v33, %v1076_v32  ;;  %v1474_v34 = vld [vmem:[#allocation7] ss:$0 sm:$0xff] }
 0x7f2   :  { %v1071_v38 = vpop.f32.mrf.mxu0 }
 0x7f3   :  { %1701 = vrot.lane.b32.xlu1 %v1700_v37, %s1905_s6 }
 0x7f4   :  { %v1636_v40 = vpop.f32.mrf.mxu0 }
 0x865   :  { %v1702_v54 = vpop.permute.xlu1 %1701 }
 0x866   :  { %v1704_v10 = vunpack.i.h.bf16 %v1702_v54  ;;  %v1703_v26 = vunpack.i.l.bf16 %v1702_v54 }
 0x868   :  { %v1109_v30 = vsel %vm1107_vm5, %v1106_v58, %v1704_v10  ;;  %v1108_v59 = vsel %vm1107_vm5, %v1105_v57, %v1703_v26 }
 0x869   :  { %v1110_v60 = vpack.c.bf16 %v1109_v30, %v1108_v59 }
 0x86b   :  { %1642 = vmatmul.mubr.msk.bf16.vlgmr.msra.gmra.mxu1 %vm139_vm1, %v1110_v60 }
 0x86c   :  { %1661 = vmatprep.mubr.msk.bf16.mxu1 %vm1893_vm0, %v1892_v0  ;;  %1654 = vmatpush3.bf16.msra.mxu1 %v1711_v19 }
 0x86d   :  { %1655 = vmatprep.subr.bf16.mxu1 %v1892_v0 }
 0x870   :  { %1656 = vmatpush3.bf16.msra.mxu1 %v1712_v41 }
 0x871   :  { %1657 = vmatprep.subr.bf16.mxu1 %v1892_v0 }
 0x874   :  { %1658 = vmatpush3.bf16.msra.mxu1 %v1713_v42 }
 0x875   :  { %1659 = vmatprep.subr.bf16.mxu1 %v1892_v0  ;;  %v1479_v0 = vld [vmem:[%s2281_s11] ss:$0 sm:$0xff] }
 0x878   :  { %1660 = vmatpush3.bf16.msra.mxu1 %v1714_v43 }
 0x92b   :  { %v1171_v56 = vpop.f32.mrf.mxu1 }
 0x92c   :  { %v1172_v61 = vadd.f32 %v1469_v53, %v1171_v56 }
 0x92d   :  { %v1643_v62 = vpop.f32.mrf.mxu1 }
 0x92e   :  { %v1178_v63 = vadd.f32 %v1172_v61, %v2017_v3 }
 0x92f   :  { %v1174_v1 = vpop.f32.mrf.mxu1 }
 0x930   :  { %v1175_v2 = vadd.f32 %v1469_v53, %v1174_v1  ;;  %v1180_v5 = vsel %vm139_vm1, %v1178_v63, 0.0 }
 0x931   :  { %1181 = vadd.xlane.f32.xlu0 %v1180_v5  ;;  %v1644_v6 = vpop.f32.mrf.mxu1 }
 0x932   :  { %v1179_v7 = vadd.f32 %v1175_v2, %v2022_v4  ;;  %v1710_v4 = vld [vmem:[#allocation8] sm:$0xff]  }
 0x933   :  { %1648 = vmatpush3.bf16.msra.mxu0 %v1710_v4 }
 0x934   :  { %v1183_v8 = vsel %vm139_vm1, %v1179_v7, 0.0 }
 0x935   :  { %1184 = vadd.xlane.f32.xlu1 %v1183_v8 }
 0x9ba   :  { %v1182_v44 = vpop.xlane.xlu0 %1181 }
 0x9bb   :  { %v1187_v9 = vmul.f32 0.03125, %v1182_v44 }
 0x9bd   :  { %v1189_v11 = vsub.f32 %v1178_v63, %v1187_v9 }
 0x9be   :  { %v1185_v12 = vpop.xlane.xlu1 %1184 }
 0x9bf   :  { %v1188_v13 = vmul.f32 0.03125, %v1185_v12  ;;  %v1191_v15 = vmul.f32 %v1189_v11, %v1189_v11 }
 0x9c1   :  { %v1190_v16 = vsub.f32 %v1179_v7, %v1188_v13  ;;  %v1193_v3 = vsel %vm139_vm1, %v1191_v15, 0.0 }
 0x9c2   :  { %1194 = vadd.xlane.f32.xlu0 %v1193_v3  ;;  %v1485_v3 = vld [vmem:[%s2282_s12] ss:$0 sm:$0xff] }
 0x9c3   :  { %v1192_v17 = vmul.f32 %v1190_v16, %v1190_v16 }
 0x9c5   :  { %v1196_v48 = vsel %vm139_vm1, %v1192_v17, 0.0 }
 0x9c6   :  { %1197 = vadd.xlane.f32.xlu0 %v1196_v48  ;;  %v1486_v48 = vld [vmem:[%s2283_s13] ss:$0 sm:$0xff] }
 0xa4b   :  { %v1195_v20 = vpop.xlane.xlu0 %1194 }
 0xa4c   :  { %v1199_v36 = vmul.f32 0.03125, %v1195_v20 }
 0xa4e   :  { %v1201_v39 = vadd.f32 1e-05, %v1199_v36 }
 0xa4f   :  { %v1198_v22 = vpop.xlane.xlu0 %1197 }
 0xa50   :  { %1747 = vrsqrt.f32 %v1201_v39  ;;  %v1200_v23 = vmul.f32 0.03125, %v1198_v22 }
 0xa52   :  { %v1202_v24 = vadd.f32 1e-05, %v1200_v23 }
 0xa54   :  { %1749 = vrsqrt.f32 %v1202_v24 }
 0xa5d   :  { %v1748_v27 = vpop.eup %1747 }
 0xa5e   :  { %v1205_v28 = vmul.f32 %v1748_v27, %v1189_v11 }
 0xa60   :  { %v1214_v33 = vmul.f32 %v1473_v29, %v1205_v28 }
 0xa61   :  { %v1750_v31 = vpop.eup %1749 }
 0xa62   :  { %v1206_v32 = vmul.f32 %v1750_v31, %v1190_v16  ;;  %v1223_v37 = vadd.f32 %v1474_v34, %v1214_v33 }
 0xa64   :  { %v1215_v35 = vmul.f32 %v1473_v29, %v1206_v32 }
 0xa66   :  { %v1224_v38 = vadd.f32 %v1474_v34, %v1215_v35 }
 0xa68   :  { %v1225_v40 = vpack.c.bf16 %v1224_v38, %v1223_v37 }
 0xa6a   :  { %1650 = vmatmul.mubr.msk.bf16.vlgmr.msra.gmra.mxu0 %vm139_vm1, %v1225_v40 }
 0xb2a   :  { %v1286_v46 = vpop.f32.mrf.mxu0 }
 0xb2b   :  { %v1287_v21 = vadd.f32 %v1475_v45, %v1286_v46 }
 0xb2c   :  { %v1651_v47 = vpop.f32.mrf.mxu0 }
 0xb2d   :  { %v1293_v51 = vmax.f32 %v1287_v21, 0.0 }
 0xb2e   :  { %v1289_v49 = vpop.f32.mrf.mxu0 }
 0xb2f   :  { %v1290_v25 = vadd.f32 %v1475_v45, %v1289_v49 }
 0xb30   :  { %v1652_v50 = vpop.f32.mrf.mxu0 }
 0xb31   :  { %v1294_v52 = vmax.f32 %v1290_v25, 0.0 }
 0xb33   :  { %v1295_v54 = vpack.c.bf16 %v1294_v52, %v1293_v51 }
 0xb35   :  { %1662 = vmatmul.mubr.msk.bf16.vlgmr.msra.gmra.mxu1 %vm1335_vm6, %v1295_v54 }
 0xbf5   :  { %v1373_v14 = vpop.f32.mrf.mxu1 }
 0xbf6   :  { %v1374_v55 = vadd.f32 %v1479_v0, %v1373_v14 }
 0xbf7   :  { %v1663_v10 = vpop.f32.mrf.mxu1 }
 0xbf8   :  { %v1380_v26 = vadd.f32 %v1374_v55, %v1223_v37 }
 0xbf9   :  { %v1376_v57 = vpop.f32.mrf.mxu1 }
 0xbfa   :  { %v1377_v58 = vadd.f32 %v1479_v0, %v1376_v57  ;;  %v1382_v30 = vsel %vm139_vm1, %v1380_v26, 0.0 }
 0xbfb   :  { %1383 = vadd.xlane.f32.xlu1 %v1382_v30  ;;  %v1664_v59 = vpop.f32.mrf.mxu1 }
 0xbfc   :  { %v1381_v60 = vadd.f32 %v1377_v58, %v1224_v38 }
 0xbfe   :  { %v1385_v53 = vsel %vm139_vm1, %v1381_v60, 0.0 }
 0xbff   :  { %1386 = vadd.xlane.f32.xlu0 %v1385_v53 }
 0xc84   :  { %v1384_v56 = vpop.xlane.xlu1 %1383 }
 0xc85   :  { %v1388_v61 = vmul.f32 0.03125, %v1384_v56 }
 0xc87   :  { %v1390_v62 = vsub.f32 %v1380_v26, %v1388_v61 }
 0xc88   :  { %v1387_v63 = vpop.xlane.xlu0 %1386 }
 0xc89   :  { %v1389_v1 = vmul.f32 0.03125, %v1387_v63  ;;  %v1392_v2 = vmul.f32 %v1390_v62, %v1390_v62 }
 0xc8b   :  { %v1391_v5 = vsub.f32 %v1381_v60, %v1389_v1  ;;  %v1394_v6 = vsel %vm139_vm1, %v1392_v2, 0.0 }
 0xc8c   :  { %1395 = vadd.xlane.f32.xlu1 %v1394_v6 }
 0xc8d   :  { %v1393_v7 = vmul.f32 %v1391_v5, %v1391_v5 }
 0xc8f   :  { %v1397_v8 = vsel %vm139_vm1, %v1393_v7, 0.0 }
 0xc90   :  { %1398 = vadd.xlane.f32.xlu0 %v1397_v8 }
 0xd15   :  { %v1396_v44 = vpop.xlane.xlu1 %1395 }
 0xd16   :  { %v1400_v9 = vmul.f32 0.03125, %v1396_v44 }
 0xd18   :  { %v1402_v11 = vadd.f32 1e-05, %v1400_v9 }
 0xd19   :  { %v1399_v12 = vpop.xlane.xlu0 %1398 }
 0xd1a   :  { %1751 = vrsqrt.f32 %v1402_v11  ;;  %v1401_v13 = vmul.f32 0.03125, %v1399_v12 }
 0xd1c   :  { %v1403_v15 = vadd.f32 1e-05, %v1401_v13 }
 0xd1e   :  { %1753 = vrsqrt.f32 %v1403_v15 }
 0xd27   :  { %v1752_v16 = vpop.eup %1751 }
 0xd28   :  { %v1406_v17 = vmul.f32 %v1752_v16, %v1390_v62 }
 0xd2a   :  { %v1415_v18 = vmul.f32 %v1485_v3, %v1406_v17 }
 0xd2b   :  { %v1754_v4 = vpop.eup %1753 }
 0xd2c   :  { %v1407_v19 = vmul.f32 %v1754_v4, %v1391_v5  ;;  %v1424_v20 = vadd.f32 %v1486_v48, %v1415_v18 }
 0xd2e   :  { %v1416_v36 = vmul.f32 %v1485_v3, %v1407_v19  ;;  %1426 = vst.msk [vmem:[#allocation11] sm:$0xff] %vm139_vm1, %v1424_v20 }
 0xd30   :  { %v1425_v39 = vadd.f32 %v1486_v48, %v1416_v36 }
 0xd32   :  { %1427 = vst.msk [vmem:[#allocation11 + $0x8] sm:$0xff] %vm139_vm1, %v1425_v39 }
 0xd33   :  { %1866 = shalt.err (!%p1863_p1)
}
 0xd34   :  { %s1907_s12 = smov 128  }
 0xd35   :  { %1439 = dma.vmem_to_hbm [thread:$0]  %s1434_s19, 256, %s2284_s14, [#allocation4], %s1907_s12, %s1907_s12, %s1904_s1  }
 0xd36   :  { %1881 = dma.done.wait [#allocation4], 256  }
 0xd37   :  { %1882 = vsyncadd [#allocation4], 4294967040 }
 0xd38   :  { %1443 = vsyncpa [#allocation3], 1 }
 0xd39   :  { %1444 = vsyncpa [#allocation6], 1 }
 0xd3a   :  { %1445 = vsyncpa [#allocation9], 1 }
 0xd3b   :  { %1446 = vsyncpa [#allocation4], 1 }

</bundles_post_ra>
